<compile_context>
chip_gen: v5e
topology: v5e:2x2
jax: 0.10.0
libtpu: 0.0.40
codegen_flags: <defaults>
</compile_context>

<pallas_src>
import functools

import jax
import jax.numpy as jnp
from jax.experimental import pallas as pl
from jax.experimental.pallas import tpu as pltpu


def _hetero_gcn_kernel(x_ref, a_ref, m_ref, tb_ref, ur_ref, mask_ref, o_ref):
    """One grid step handles B samples; K is reduced in registers.

    x_ref:    (B, C_in, T*V)   input block (lane-dense T*V)
    a_ref:    (B, K, V, V)     raw per-sample adjacency (no kron inflation)
    m_ref:    (K*C_out, C_in)  folded TM^T @ W          (constant, VMEM-resident)
    tb_ref:   (K*C_out, 1)     folded TM^T @ b          (constant, VMEM-resident)
    ur_ref:   (V, T*V)         [I_V I_V ... I_V]        (constant, VMEM-resident)
    mask_ref: (T*V, T*V)       block-diagonal 0/1 mask  (constant, VMEM-resident)
    o_ref:    (B, C_out, T*V)
    """
    bsz = x_ref.shape[0]
    num_k = a_ref.shape[1]
    v = a_ref.shape[2]
    tv = x_ref.shape[2]
    t = tv // v
    c_out = o_ref.shape[1]

    m = m_ref[...]                        # (K*C_out, C_in)
    tb = tb_ref[...]                      # (K*C_out, 1)
    ur = ur_ref[...]                      # (V, T*V)
    mask = mask_ref[...]                  # (T*V, T*V)

    for b in range(bsz):                  # static unroll; acc dies at each store
        xb = x_ref[b]                     # (C_in, T*V)
        # 1x1 conv + channel transform + bias for all K: one matmul + one add.
        y = jnp.dot(m, xb, preferred_element_type=jnp.float32) + tb   # (K*C_out, T*V)

        acc = None
        for k in range(num_k):
            a_k = a_ref[b, k]                                          # (V, V)
            # horizontal tiling: h[v, t*V + w] = A[v, w]
            h = jnp.dot(a_k, ur, preferred_element_type=jnp.float32)   # (V, T*V)
            # vertical tiling (sublane concat of 16-row pieces), then mask
            tiled = jnp.concatenate([h] * t, axis=0)                   # (T*V, T*V)
            blk = tiled * mask                                         # kron(I_T, A_k)
            part = jnp.dot(y[k * c_out:(k + 1) * c_out, :], blk,
                           preferred_element_type=jnp.float32)         # (C_out, T*V)
            acc = part if acc is None else acc + part
        o_ref[b] = acc.astype(o_ref.dtype)                             # lane-dense store


def _pick_batch_block(n, max_b):
    """Largest divisor of n that is <= max_b (keeps the grid exact)."""
    for b in range(min(max_b, n), 0, -1):
        if n % b == 0:
            return b
    return 1


def hetero_graph_conv(x, A, transform_matrix, conv_weight, conv_bias,
                      kernel_size, batch_block=8):
    """Pallas implementation of HeteroGraphConv.forward (t_kernel_size == 1).

    x:                (N, C_in, T, V)  float32  (NCHW)
    A:                (N, K, V, V)
    transform_matrix: (K, C_out, C_out)
    conv_weight:      (K*C_out, C_in)   (Conv2d weight with the trailing 1x1 squeezed)
    conv_bias:        (K*C_out,)
    returns: (out, A) with out of shape (N, C_out, T, V)
    """
    n, c_in, t, v = x.shape
    k = kernel_size
    kc = conv_weight.shape[0]
    c_out = kc // k
    tv = t * v

    # ---- shape / layout guards --------------------------------------------
    assert A.shape == (n, k, v, v), ("A must be (N, kernel_size, V, V)", A.shape)
    assert transform_matrix.shape == (k, c_out, c_out), transform_matrix.shape
    assert conv_weight.shape == (kc, c_in), conv_weight.shape
    assert conv_bias.shape == (kc,), conv_bias.shape
    assert c_out % 8 == 0, "C_out must be a multiple of 8 (sublane-aligned y_k slices)"
    assert tv % 128 == 0, "T*V must be a multiple of 128 (lane-dense blocks/stores)"
    # TODO(synk): t_kernel_size > 1 / stride / padding not supported here.

    bsz = _pick_batch_block(n, batch_block)

    # ---- weight folding (once per call, independent of N/T/V) --------------
    w_k = conv_weight.reshape(k, c_out, c_in)                  # (K, C_out, C_in)
    b_k = conv_bias.reshape(k, c_out)                          # (K, C_out)
    m = jnp.einsum('kcx,kci->kxi', transform_matrix, w_k)      # (K, C_out, C_in)
    tb = jnp.einsum('kcx,kc->kx', transform_matrix, b_k)       # (K, C_out)
    m = m.reshape(kc, c_in).astype(jnp.float32)                # (K*C_out, C_in)
    tb = tb.reshape(kc, 1).astype(jnp.float32)                 # (K*C_out, 1)

    # ---- tiny static helpers for the in-kernel kron(I_T, A) build ----------
    ur = jnp.tile(jnp.eye(v, dtype=jnp.float32), (1, t))       # (V, T*V)
    mask = jnp.kron(jnp.eye(t, dtype=jnp.float32),
                    jnp.ones((v, v), dtype=jnp.float32))       # (T*V, T*V)

    x2 = x.reshape(n, c_in, tv)          # free contiguous reshape, no HBM copy

    out2 = pl.pallas_call(
        _hetero_gcn_kernel,
        out_shape=jax.ShapeDtypeStruct((n, c_out, tv), jnp.float32),
        grid=(n // bsz,),
        in_specs=[
            pl.BlockSpec((bsz, c_in, tv), lambda i: (i, 0, 0)),
            pl.BlockSpec((bsz, k, v, v), lambda i: (i, 0, 0, 0)),
            # constant index_maps: DMA'd once, stay VMEM-resident
            pl.BlockSpec((kc, c_in), lambda i: (0, 0)),
            pl.BlockSpec((kc, 1), lambda i: (0, 0)),
            pl.BlockSpec((v, tv), lambda i: (0, 0)),
            pl.BlockSpec((tv, tv), lambda i: (0, 0)),
        ],
        out_specs=pl.BlockSpec((bsz, c_out, tv), lambda i: (i, 0, 0)),
        compiler_params=pltpu.CompilerParams(
            dimension_semantics=("parallel",)),
    )(x2, A, m, tb, ur, mask)

    out = out2.reshape(n, c_out, t, v)
    return out, A


def reference_forward(x, A, transform_matrix, conv_weight, conv_bias, kernel_size):
    """Pure-JAX replica of the PyTorch forward, for correctness checking."""
    n, c_in, t, v = x.shape
    kc = conv_weight.shape[0]
    c = kc // kernel_size
    y = jnp.einsum('oc,nctv->notv', conv_weight, x) + conv_bias[None, :, None, None]
    y = y.reshape(n, kernel_size, c, t, v)
    xt = jnp.einsum('nkctv,kcx->nkxtv', y, transform_matrix)
    out = jnp.einsum('nkxtv,nkvw->nxtw', xt, A)
    return out


if __name__ == "__main__":
    # Small, module-consistent shapes (T*V = 128 -> lane-dense blocks).
    N, C_IN, C_OUT, K, T, V = 8, 4, 8, 3, 8, 16

    key = jax.random.PRNGKey(0)
    kx, ka, ktm, kw, kb = jax.random.split(key, 5)

    x = jax.random.normal(kx, (N, C_IN, T, V), dtype=jnp.float32)
    A = jax.random.normal(ka, (N, K, V, V), dtype=jnp.float32) * 0.1
    transform_matrix = jax.random.normal(ktm, (K, C_OUT, C_OUT), dtype=jnp.float32) * 0.1
    conv_weight = jax.random.normal(kw, (K * C_OUT, C_IN), dtype=jnp.float32) * 0.1
    conv_bias = jax.random.normal(kb, (K * C_OUT,), dtype=jnp.float32) * 0.1

    fwd = jax.jit(functools.partial(hetero_graph_conv, kernel_size=K, batch_block=4))
    out, A_out = fwd(x, A, transform_matrix, conv_weight, conv_bias)
    jax.block_until_ready(out)

    ref = reference_forward(x, A, transform_matrix, conv_weight, conv_bias, K)
    assert out.shape == (N, C_OUT, T, V), out.shape
    assert A_out.shape == A.shape
    assert jnp.allclose(out, ref, rtol=1e-4, atol=1e-4), float(jnp.max(jnp.abs(out - ref)))

    print("KERNEL_OK")
</pallas_src>

<mosaic_0001>
module attributes {stable_mosaic.version = 11 : i64} {
  func.func @_hetero_gcn_kernel(%arg0: i32, %arg1: memref<4x4x128xf32, #tpu.memory_space<vmem>>, %arg2: memref<4x3x16x16xf32, #tpu.memory_space<vmem>>, %arg3: memref<24x4xf32, #tpu.memory_space<vmem>>, %arg4: memref<24x1xf32, #tpu.memory_space<vmem>>, %arg5: memref<16x128xf32, #tpu.memory_space<vmem>>, %arg6: memref<128x128xf32, #tpu.memory_space<vmem>>, %arg7: memref<4x8x128xf32, #tpu.memory_space<vmem>>) attributes {dimension_semantics = [#tpu.dimension_semantics<parallel>], iteration_bounds = array<i64: 2>, scalar_prefetch = 0 : i64, scratch_operands = 0 : i64, tpu.core_type = #tpu.core_type<tc>, window_params = [{transform_indices = @transform_0, window_bounds = array<i64: 4, 4, 128>}, {transform_indices = @transform_1, window_bounds = array<i64: 4, 3, 16, 16>}, {pipeline_mode = #tpu.pipeline_mode<synchronous>, transform_indices = @transform_2, window_bounds = array<i64: 24, 4>}, {pipeline_mode = #tpu.pipeline_mode<synchronous>, transform_indices = @transform_3, window_bounds = array<i64: 24, 1>}, {pipeline_mode = #tpu.pipeline_mode<synchronous>, transform_indices = @transform_4, window_bounds = array<i64: 16, 128>}, {pipeline_mode = #tpu.pipeline_mode<synchronous>, transform_indices = @transform_5, window_bounds = array<i64: 128, 128>}, {transform_indices = @transform_6, window_bounds = array<i64: 4, 8, 128>}]} {
    %c0 = arith.constant 0 : index
    %c0_0 = arith.constant 0 : index
    %0 = vector.load %arg3[%c0, %c0_0] : memref<24x4xf32, #tpu.memory_space<vmem>>, vector<24x4xf32>
    %c0_1 = arith.constant 0 : index
    %c0_2 = arith.constant 0 : index
    %1 = vector.load %arg4[%c0_1, %c0_2] : memref<24x1xf32, #tpu.memory_space<vmem>>, vector<24x1xf32>
    %c0_3 = arith.constant 0 : index
    %c0_4 = arith.constant 0 : index
    %2 = vector.load %arg5[%c0_3, %c0_4] : memref<16x128xf32, #tpu.memory_space<vmem>>, vector<16x128xf32>
    %c0_5 = arith.constant 0 : index
    %c0_6 = arith.constant 0 : index
    %3 = vector.load %arg6[%c0_5, %c0_6] : memref<128x128xf32, #tpu.memory_space<vmem>>, vector<128x128xf32>
    %c0_7 = arith.constant 0 : index
    %c0_8 = arith.constant 0 : index
    %c0_9 = arith.constant 0 : index
    %4 = vector.load %arg1[%c0_7, %c0_8, %c0_9] : memref<4x4x128xf32, #tpu.memory_space<vmem>>, vector<1x4x128xf32>
    %5 = vector.shape_cast %4 : vector<1x4x128xf32> to vector<4x128xf32>
    %cst = arith.constant dense<0.000000e+00> : vector<24x128xf32>
    %6 = tpu.matmul %0, %5, %cst {dimension_numbers = #tpu.dot_dimension_numbers<[1], [0], [0], [1], [0, 0, 1, 1], [], []>} : vector<24x4xf32>, vector<4x128xf32>, vector<24x128xf32> -> vector<24x128xf32>
    %7 = vector.broadcast %1 : vector<24x1xf32> to vector<24x128xf32>
    %8 = arith.addf %6, %7 : vector<24x128xf32>
    %c0_10 = arith.constant 0 : index
    %c0_11 = arith.constant 0 : index
    %c0_12 = arith.constant 0 : index
    %c0_13 = arith.constant 0 : index
    %9 = vector.load %arg2[%c0_10, %c0_11, %c0_12, %c0_13] : memref<4x3x16x16xf32, #tpu.memory_space<vmem>>, vector<1x1x16x16xf32>
    %10 = vector.shape_cast %9 : vector<1x1x16x16xf32> to vector<16x16xf32>
    %cst_14 = arith.constant dense<0.000000e+00> : vector<16x128xf32>
    %11 = tpu.matmul %10, %2, %cst_14 {dimension_numbers = #tpu.dot_dimension_numbers<[1], [0], [0], [1], [0, 0, 1, 1], [], []>} : vector<16x16xf32>, vector<16x128xf32>, vector<16x128xf32> -> vector<16x128xf32>
    %12 = tpu.concatenate %11, %11, %11, %11, %11, %11, %11, %11 in 0 : vector<16x128xf32>, vector<16x128xf32>, vector<16x128xf32>, vector<16x128xf32>, vector<16x128xf32>, vector<16x128xf32>, vector<16x128xf32>, vector<16x128xf32> -> vector<128x128xf32>
    %13 = arith.mulf %12, %3 : vector<128x128xf32>
    %14 = vector.extract_strided_slice %8 {offsets = [0, 0], sizes = [8, 128], strides = [1, 1]} : vector<24x128xf32> to vector<8x128xf32>
    %cst_15 = arith.constant dense<0.000000e+00> : vector<8x128xf32>
    %15 = tpu.matmul %14, %13, %cst_15 {dimension_numbers = #tpu.dot_dimension_numbers<[1], [0], [0], [1], [0, 0, 1, 1], [], []>} : vector<8x128xf32>, vector<128x128xf32>, vector<8x128xf32> -> vector<8x128xf32>
    %c0_16 = arith.constant 0 : index
    %c1 = arith.constant 1 : index
    %c0_17 = arith.constant 0 : index
    %c0_18 = arith.constant 0 : index
    %16 = vector.load %arg2[%c0_16, %c1, %c0_17, %c0_18] : memref<4x3x16x16xf32, #tpu.memory_space<vmem>>, vector<1x1x16x16xf32>
    %17 = vector.shape_cast %16 : vector<1x1x16x16xf32> to vector<16x16xf32>
    %cst_19 = arith.constant dense<0.000000e+00> : vector<16x128xf32>
    %18 = tpu.matmul %17, %2, %cst_19 {dimension_numbers = #tpu.dot_dimension_numbers<[1], [0], [0], [1], [0, 0, 1, 1], [], []>} : vector<16x16xf32>, vector<16x128xf32>, vector<16x128xf32> -> vector<16x128xf32>
    %19 = tpu.concatenate %18, %18, %18, %18, %18, %18, %18, %18 in 0 : vector<16x128xf32>, vector<16x128xf32>, vector<16x128xf32>, vector<16x128xf32>, vector<16x128xf32>, vector<16x128xf32>, vector<16x128xf32>, vector<16x128xf32> -> vector<128x128xf32>
    %20 = arith.mulf %19, %3 : vector<128x128xf32>
    %21 = vector.extract_strided_slice %8 {offsets = [8, 0], sizes = [8, 128], strides = [1, 1]} : vector<24x128xf32> to vector<8x128xf32>
    %cst_20 = arith.constant dense<0.000000e+00> : vector<8x128xf32>
    %22 = tpu.matmul %21, %20, %cst_20 {dimension_numbers = #tpu.dot_dimension_numbers<[1], [0], [0], [1], [0, 0, 1, 1], [], []>} : vector<8x128xf32>, vector<128x128xf32>, vector<8x128xf32> -> vector<8x128xf32>
    %23 = arith.addf %15, %22 : vector<8x128xf32>
    %c0_21 = arith.constant 0 : index
    %c2 = arith.constant 2 : index
    %c0_22 = arith.constant 0 : index
    %c0_23 = arith.constant 0 : index
    %24 = vector.load %arg2[%c0_21, %c2, %c0_22, %c0_23] : memref<4x3x16x16xf32, #tpu.memory_space<vmem>>, vector<1x1x16x16xf32>
    %25 = vector.shape_cast %24 : vector<1x1x16x16xf32> to vector<16x16xf32>
    %cst_24 = arith.constant dense<0.000000e+00> : vector<16x128xf32>
    %26 = tpu.matmul %25, %2, %cst_24 {dimension_numbers = #tpu.dot_dimension_numbers<[1], [0], [0], [1], [0, 0, 1, 1], [], []>} : vector<16x16xf32>, vector<16x128xf32>, vector<16x128xf32> -> vector<16x128xf32>
    %27 = tpu.concatenate %26, %26, %26, %26, %26, %26, %26, %26 in 0 : vector<16x128xf32>, vector<16x128xf32>, vector<16x128xf32>, vector<16x128xf32>, vector<16x128xf32>, vector<16x128xf32>, vector<16x128xf32>, vector<16x128xf32> -> vector<128x128xf32>
    %28 = arith.mulf %27, %3 : vector<128x128xf32>
    %29 = vector.extract_strided_slice %8 {offsets = [16, 0], sizes = [8, 128], strides = [1, 1]} : vector<24x128xf32> to vector<8x128xf32>
    %cst_25 = arith.constant dense<0.000000e+00> : vector<8x128xf32>
    %30 = tpu.matmul %29, %28, %cst_25 {dimension_numbers = #tpu.dot_dimension_numbers<[1], [0], [0], [1], [0, 0, 1, 1], [], []>} : vector<8x128xf32>, vector<128x128xf32>, vector<8x128xf32> -> vector<8x128xf32>
    %31 = arith.addf %23, %30 : vector<8x128xf32>
    %c0_26 = arith.constant 0 : index
    %c0_27 = arith.constant 0 : index
    %c0_28 = arith.constant 0 : index
    %32 = vector.load %arg7[%c0_26, %c0_27, %c0_28] : memref<4x8x128xf32, #tpu.memory_space<vmem>>, vector<1x8x128xf32>
    %33 = vector.shape_cast %32 : vector<1x8x128xf32> to vector<8x128xf32>
    %34 = vector.shape_cast %31 : vector<8x128xf32> to vector<1x8x128xf32>
    tpu.vector_store %arg7[%c0_26, %c0_27, %c0_28], %34 {strides = array<i32>} : memref<4x8x128xf32, #tpu.memory_space<vmem>>, vector<1x8x128xf32>,
    %c1_29 = arith.constant 1 : index
    %c0_30 = arith.constant 0 : index
    %c0_31 = arith.constant 0 : index
    %35 = vector.load %arg1[%c1_29, %c0_30, %c0_31] : memref<4x4x128xf32, #tpu.memory_space<vmem>>, vector<1x4x128xf32>
    %36 = vector.shape_cast %35 : vector<1x4x128xf32> to vector<4x128xf32>
    %cst_32 = arith.constant dense<0.000000e+00> : vector<24x128xf32>
    %37 = tpu.matmul %0, %36, %cst_32 {dimension_numbers = #tpu.dot_dimension_numbers<[1], [0], [0], [1], [0, 0, 1, 1], [], []>} : vector<24x4xf32>, vector<4x128xf32>, vector<24x128xf32> -> vector<24x128xf32>
    %38 = vector.broadcast %1 : vector<24x1xf32> to vector<24x128xf32>
    %39 = arith.addf %37, %38 : vector<24x128xf32>
    %c1_33 = arith.constant 1 : index
    %c0_34 = arith.constant 0 : index
    %c0_35 = arith.constant 0 : index
    %c0_36 = arith.constant 0 : index
    %40 = vector.load %arg2[%c1_33, %c0_34, %c0_35, %c0_36] : memref<4x3x16x16xf32, #tpu.memory_space<vmem>>, vector<1x1x16x16xf32>
    %41 = vector.shape_cast %40 : vector<1x1x16x16xf32> to vector<16x16xf32>
    %cst_37 = arith.constant dense<0.000000e+00> : vector<16x128xf32>
    %42 = tpu.matmul %41, %2, %cst_37 {dimension_numbers = #tpu.dot_dimension_numbers<[1], [0], [0], [1], [0, 0, 1, 1], [], []>} : vector<16x16xf32>, vector<16x128xf32>, vector<16x128xf32> -> vector<16x128xf32>
    %43 = tpu.concatenate %42, %42, %42, %42, %42, %42, %42, %42 in 0 : vector<16x128xf32>, vector<16x128xf32>, vector<16x128xf32>, vector<16x128xf32>, vector<16x128xf32>, vector<16x128xf32>, vector<16x128xf32>, vector<16x128xf32> -> vector<128x128xf32>
    %44 = arith.mulf %43, %3 : vector<128x128xf32>
    %45 = vector.extract_strided_slice %39 {offsets = [0, 0], sizes = [8, 128], strides = [1, 1]} : vector<24x128xf32> to vector<8x128xf32>
    %cst_38 = arith.constant dense<0.000000e+00> : vector<8x128xf32>
    %46 = tpu.matmul %45, %44, %cst_38 {dimension_numbers = #tpu.dot_dimension_numbers<[1], [0], [0], [1], [0, 0, 1, 1], [], []>} : vector<8x128xf32>, vector<128x128xf32>, vector<8x128xf32> -> vector<8x128xf32>
    %c1_39 = arith.constant 1 : index
    %c1_40 = arith.constant 1 : index
    %c0_41 = arith.constant 0 : index
    %c0_42 = arith.constant 0 : index
    %47 = vector.load %arg2[%c1_39, %c1_40, %c0_41, %c0_42] : memref<4x3x16x16xf32, #tpu.memory_space<vmem>>, vector<1x1x16x16xf32>
    %48 = vector.shape_cast %47 : vector<1x1x16x16xf32> to vector<16x16xf32>
    %cst_43 = arith.constant dense<0.000000e+00> : vector<16x128xf32>
    %49 = tpu.matmul %48, %2, %cst_43 {dimension_numbers = #tpu.dot_dimension_numbers<[1], [0], [0], [1], [0, 0, 1, 1], [], []>} : vector<16x16xf32>, vector<16x128xf32>, vector<16x128xf32> -> vector<16x128xf32>
    %50 = tpu.concatenate %49, %49, %49, %49, %49, %49, %49, %49 in 0 : vector<16x128xf32>, vector<16x128xf32>, vector<16x128xf32>, vector<16x128xf32>, vector<16x128xf32>, vector<16x128xf32>, vector<16x128xf32>, vector<16x128xf32> -> vector<128x128xf32>
    %51 = arith.mulf %50, %3 : vector<128x128xf32>
    %52 = vector.extract_strided_slice %39 {offsets = [8, 0], sizes = [8, 128], strides = [1, 1]} : vector<24x128xf32> to vector<8x128xf32>
    %cst_44 = arith.constant dense<0.000000e+00> : vector<8x128xf32>
    %53 = tpu.matmul %52, %51, %cst_44 {dimension_numbers = #tpu.dot_dimension_numbers<[1], [0], [0], [1], [0, 0, 1, 1], [], []>} : vector<8x128xf32>, vector<128x128xf32>, vector<8x128xf32> -> vector<8x128xf32>
    %54 = arith.addf %46, %53 : vector<8x128xf32>
    %c1_45 = arith.constant 1 : index
    %c2_46 = arith.constant 2 : index
    %c0_47 = arith.constant 0 : index
    %c0_48 = arith.constant 0 : index
    %55 = vector.load %arg2[%c1_45, %c2_46, %c0_47, %c0_48] : memref<4x3x16x16xf32, #tpu.memory_space<vmem>>, vector<1x1x16x16xf32>
    %56 = vector.shape_cast %55 : vector<1x1x16x16xf32> to vector<16x16xf32>
    %cst_49 = arith.constant dense<0.000000e+00> : vector<16x128xf32>
    %57 = tpu.matmul %56, %2, %cst_49 {dimension_numbers = #tpu.dot_dimension_numbers<[1], [0], [0], [1], [0, 0, 1, 1], [], []>} : vector<16x16xf32>, vector<16x128xf32>, vector<16x128xf32> -> vector<16x128xf32>
    %58 = tpu.concatenate %57, %57, %57, %57, %57, %57, %57, %57 in 0 : vector<16x128xf32>, vector<16x128xf32>, vector<16x128xf32>, vector<16x128xf32>, vector<16x128xf32>, vector<16x128xf32>, vector<16x128xf32>, vector<16x128xf32> -> vector<128x128xf32>
    %59 = arith.mulf %58, %3 : vector<128x128xf32>
    %60 = vector.extract_strided_slice %39 {offsets = [16, 0], sizes = [8, 128], strides = [1, 1]} : vector<24x128xf32> to vector<8x128xf32>
    %cst_50 = arith.constant dense<0.000000e+00> : vector<8x128xf32>
    %61 = tpu.matmul %60, %59, %cst_50 {dimension_numbers = #tpu.dot_dimension_numbers<[1], [0], [0], [1], [0, 0, 1, 1], [], []>} : vector<8x128xf32>, vector<128x128xf32>, vector<8x128xf32> -> vector<8x128xf32>
    %62 = arith.addf %54, %61 : vector<8x128xf32>
    %c1_51 = arith.constant 1 : index
    %c0_52 = arith.constant 0 : index
    %c0_53 = arith.constant 0 : index
    %63 = vector.load %arg7[%c1_51, %c0_52, %c0_53] : memref<4x8x128xf32, #tpu.memory_space<vmem>>, vector<1x8x128xf32>
    %64 = vector.shape_cast %63 : vector<1x8x128xf32> to vector<8x128xf32>
    %65 = vector.shape_cast %62 : vector<8x128xf32> to vector<1x8x128xf32>
    tpu.vector_store %arg7[%c1_51, %c0_52, %c0_53], %65 {strides = array<i32>} : memref<4x8x128xf32, #tpu.memory_space<vmem>>, vector<1x8x128xf32>,
    %c2_54 = arith.constant 2 : index
    %c0_55 = arith.constant 0 : index
    %c0_56 = arith.constant 0 : index
    %66 = vector.load %arg1[%c2_54, %c0_55, %c0_56] : memref<4x4x128xf32, #tpu.memory_space<vmem>>, vector<1x4x128xf32>
    %67 = vector.shape_cast %66 : vector<1x4x128xf32> to vector<4x128xf32>
    %cst_57 = arith.constant dense<0.000000e+00> : vector<24x128xf32>
    %68 = tpu.matmul %0, %67, %cst_57 {dimension_numbers = #tpu.dot_dimension_numbers<[1], [0], [0], [1], [0, 0, 1, 1], [], []>} : vector<24x4xf32>, vector<4x128xf32>, vector<24x128xf32> -> vector<24x128xf32>
    %69 = vector.broadcast %1 : vector<24x1xf32> to vector<24x128xf32>
    %70 = arith.addf %68, %69 : vector<24x128xf32>
    %c2_58 = arith.constant 2 : index
    %c0_59 = arith.constant 0 : index
    %c0_60 = arith.constant 0 : index
    %c0_61 = arith.constant 0 : index
    %71 = vector.load %arg2[%c2_58, %c0_59, %c0_60, %c0_61] : memref<4x3x16x16xf32, #tpu.memory_space<vmem>>, vector<1x1x16x16xf32>
    %72 = vector.shape_cast %71 : vector<1x1x16x16xf32> to vector<16x16xf32>
    %cst_62 = arith.constant dense<0.000000e+00> : vector<16x128xf32>
    %73 = tpu.matmul %72, %2, %cst_62 {dimension_numbers = #tpu.dot_dimension_numbers<[1], [0], [0], [1], [0, 0, 1, 1], [], []>} : vector<16x16xf32>, vector<16x128xf32>, vector<16x128xf32> -> vector<16x128xf32>
    %74 = tpu.concatenate %73, %73, %73, %73, %73, %73, %73, %73 in 0 : vector<16x128xf32>, vector<16x128xf32>, vector<16x128xf32>, vector<16x128xf32>, vector<16x128xf32>, vector<16x128xf32>, vector<16x128xf32>, vector<16x128xf32> -> vector<128x128xf32>
    %75 = arith.mulf %74, %3 : vector<128x128xf32>
    %76 = vector.extract_strided_slice %70 {offsets = [0, 0], sizes = [8, 128], strides = [1, 1]} : vector<24x128xf32> to vector<8x128xf32>
    %cst_63 = arith.constant dense<0.000000e+00> : vector<8x128xf32>
    %77 = tpu.matmul %76, %75, %cst_63 {dimension_numbers = #tpu.dot_dimension_numbers<[1], [0], [0], [1], [0, 0, 1, 1], [], []>} : vector<8x128xf32>, vector<128x128xf32>, vector<8x128xf32> -> vector<8x128xf32>
    %c2_64 = arith.constant 2 : index
    %c1_65 = arith.constant 1 : index
    %c0_66 = arith.constant 0 : index
    %c0_67 = arith.constant 0 : index
    %78 = vector.load %arg2[%c2_64, %c1_65, %c0_66, %c0_67] : memref<4x3x16x16xf32, #tpu.memory_space<vmem>>, vector<1x1x16x16xf32>
    %79 = vector.shape_cast %78 : vector<1x1x16x16xf32> to vector<16x16xf32>
    %cst_68 = arith.constant dense<0.000000e+00> : vector<16x128xf32>
    %80 = tpu.matmul %79, %2, %cst_68 {dimension_numbers = #tpu.dot_dimension_numbers<[1], [0], [0], [1], [0, 0, 1, 1], [], []>} : vector<16x16xf32>, vector<16x128xf32>, vector<16x128xf32> -> vector<16x128xf32>
    %81 = tpu.concatenate %80, %80, %80, %80, %80, %80, %80, %80 in 0 : vector<16x128xf32>, vector<16x128xf32>, vector<16x128xf32>, vector<16x128xf32>, vector<16x128xf32>, vector<16x128xf32>, vector<16x128xf32>, vector<16x128xf32> -> vector<128x128xf32>
    %82 = arith.mulf %81, %3 : vector<128x128xf32>
    %83 = vector.extract_strided_slice %70 {offsets = [8, 0], sizes = [8, 128], strides = [1, 1]} : vector<24x128xf32> to vector<8x128xf32>
    %cst_69 = arith.constant dense<0.000000e+00> : vector<8x128xf32>
    %84 = tpu.matmul %83, %82, %cst_69 {dimension_numbers = #tpu.dot_dimension_numbers<[1], [0], [0], [1], [0, 0, 1, 1], [], []>} : vector<8x128xf32>, vector<128x128xf32>, vector<8x128xf32> -> vector<8x128xf32>
    %85 = arith.addf %77, %84 : vector<8x128xf32>
    %c2_70 = arith.constant 2 : index
    %c2_71 = arith.constant 2 : index
    %c0_72 = arith.constant 0 : index
    %c0_73 = arith.constant 0 : index
    %86 = vector.load %arg2[%c2_70, %c2_71, %c0_72, %c0_73] : memref<4x3x16x16xf32, #tpu.memory_space<vmem>>, vector<1x1x16x16xf32>
    %87 = vector.shape_cast %86 : vector<1x1x16x16xf32> to vector<16x16xf32>
    %cst_74 = arith.constant dense<0.000000e+00> : vector<16x128xf32>
    %88 = tpu.matmul %87, %2, %cst_74 {dimension_numbers = #tpu.dot_dimension_numbers<[1], [0], [0], [1], [0, 0, 1, 1], [], []>} : vector<16x16xf32>, vector<16x128xf32>, vector<16x128xf32> -> vector<16x128xf32>
    %89 = tpu.concatenate %88, %88, %88, %88, %88, %88, %88, %88 in 0 : vector<16x128xf32>, vector<16x128xf32>, vector<16x128xf32>, vector<16x128xf32>, vector<16x128xf32>, vector<16x128xf32>, vector<16x128xf32>, vector<16x128xf32> -> vector<128x128xf32>
    %90 = arith.mulf %89, %3 : vector<128x128xf32>
    %91 = vector.extract_strided_slice %70 {offsets = [16, 0], sizes = [8, 128], strides = [1, 1]} : vector<24x128xf32> to vector<8x128xf32>
    %cst_75 = arith.constant dense<0.000000e+00> : vector<8x128xf32>
    %92 = tpu.matmul %91, %90, %cst_75 {dimension_numbers = #tpu.dot_dimension_numbers<[1], [0], [0], [1], [0, 0, 1, 1], [], []>} : vector<8x128xf32>, vector<128x128xf32>, vector<8x128xf32> -> vector<8x128xf32>
    %93 = arith.addf %85, %92 : vector<8x128xf32>
    %c2_76 = arith.constant 2 : index
    %c0_77 = arith.constant 0 : index
    %c0_78 = arith.constant 0 : index
    %94 = vector.load %arg7[%c2_76, %c0_77, %c0_78] : memref<4x8x128xf32, #tpu.memory_space<vmem>>, vector<1x8x128xf32>
    %95 = vector.shape_cast %94 : vector<1x8x128xf32> to vector<8x128xf32>
    %96 = vector.shape_cast %93 : vector<8x128xf32> to vector<1x8x128xf32>
    tpu.vector_store %arg7[%c2_76, %c0_77, %c0_78], %96 {strides = array<i32>} : memref<4x8x128xf32, #tpu.memory_space<vmem>>, vector<1x8x128xf32>,
    %c3 = arith.constant 3 : index
    %c0_79 = arith.constant 0 : index
    %c0_80 = arith.constant 0 : index
    %97 = vector.load %arg1[%c3, %c0_79, %c0_80] : memref<4x4x128xf32, #tpu.memory_space<vmem>>, vector<1x4x128xf32>
    %98 = vector.shape_cast %97 : vector<1x4x128xf32> to vector<4x128xf32>
    %cst_81 = arith.constant dense<0.000000e+00> : vector<24x128xf32>
    %99 = tpu.matmul %0, %98, %cst_81 {dimension_numbers = #tpu.dot_dimension_numbers<[1], [0], [0], [1], [0, 0, 1, 1], [], []>} : vector<24x4xf32>, vector<4x128xf32>, vector<24x128xf32> -> vector<24x128xf32>
    %100 = vector.broadcast %1 : vector<24x1xf32> to vector<24x128xf32>
    %101 = arith.addf %99, %100 : vector<24x128xf32>
    %c3_82 = arith.constant 3 : index
    %c0_83 = arith.constant 0 : index
    %c0_84 = arith.constant 0 : index
    %c0_85 = arith.constant 0 : index
    %102 = vector.load %arg2[%c3_82, %c0_83, %c0_84, %c0_85] : memref<4x3x16x16xf32, #tpu.memory_space<vmem>>, vector<1x1x16x16xf32>
    %103 = vector.shape_cast %102 : vector<1x1x16x16xf32> to vector<16x16xf32>
    %cst_86 = arith.constant dense<0.000000e+00> : vector<16x128xf32>
    %104 = tpu.matmul %103, %2, %cst_86 {dimension_numbers = #tpu.dot_dimension_numbers<[1], [0], [0], [1], [0, 0, 1, 1], [], []>} : vector<16x16xf32>, vector<16x128xf32>, vector<16x128xf32> -> vector<16x128xf32>
    %105 = tpu.concatenate %104, %104, %104, %104, %104, %104, %104, %104 in 0 : vector<16x128xf32>, vector<16x128xf32>, vector<16x128xf32>, vector<16x128xf32>, vector<16x128xf32>, vector<16x128xf32>, vector<16x128xf32>, vector<16x128xf32> -> vector<128x128xf32>
    %106 = arith.mulf %105, %3 : vector<128x128xf32>
    %107 = vector.extract_strided_slice %101 {offsets = [0, 0], sizes = [8, 128], strides = [1, 1]} : vector<24x128xf32> to vector<8x128xf32>
    %cst_87 = arith.constant dense<0.000000e+00> : vector<8x128xf32>
    %108 = tpu.matmul %107, %106, %cst_87 {dimension_numbers = #tpu.dot_dimension_numbers<[1], [0], [0], [1], [0, 0, 1, 1], [], []>} : vector<8x128xf32>, vector<128x128xf32>, vector<8x128xf32> -> vector<8x128xf32>
    %c3_88 = arith.constant 3 : index
    %c1_89 = arith.constant 1 : index
    %c0_90 = arith.constant 0 : index
    %c0_91 = arith.constant 0 : index
    %109 = vector.load %arg2[%c3_88, %c1_89, %c0_90, %c0_91] : memref<4x3x16x16xf32, #tpu.memory_space<vmem>>, vector<1x1x16x16xf32>
    %110 = vector.shape_cast %109 : vector<1x1x16x16xf32> to vector<16x16xf32>
    %cst_92 = arith.constant dense<0.000000e+00> : vector<16x128xf32>
    %111 = tpu.matmul %110, %2, %cst_92 {dimension_numbers = #tpu.dot_dimension_numbers<[1], [0], [0], [1], [0, 0, 1, 1], [], []>} : vector<16x16xf32>, vector<16x128xf32>, vector<16x128xf32> -> vector<16x128xf32>
    %112 = tpu.concatenate %111, %111, %111, %111, %111, %111, %111, %111 in 0 : vector<16x128xf32>, vector<16x128xf32>, vector<16x128xf32>, vector<16x128xf32>, vector<16x128xf32>, vector<16x128xf32>, vector<16x128xf32>, vector<16x128xf32> -> vector<128x128xf32>
    %113 = arith.mulf %112, %3 : vector<128x128xf32>
    %114 = vector.extract_strided_slice %101 {offsets = [8, 0], sizes = [8, 128], strides = [1, 1]} : vector<24x128xf32> to vector<8x128xf32>
    %cst_93 = arith.constant dense<0.000000e+00> : vector<8x128xf32>
    %115 = tpu.matmul %114, %113, %cst_93 {dimension_numbers = #tpu.dot_dimension_numbers<[1], [0], [0], [1], [0, 0, 1, 1], [], []>} : vector<8x128xf32>, vector<128x128xf32>, vector<8x128xf32> -> vector<8x128xf32>
    %116 = arith.addf %108, %115 : vector<8x128xf32>
    %c3_94 = arith.constant 3 : index
    %c2_95 = arith.constant 2 : index
    %c0_96 = arith.constant 0 : index
    %c0_97 = arith.constant 0 : index
    %117 = vector.load %arg2[%c3_94, %c2_95, %c0_96, %c0_97] : memref<4x3x16x16xf32, #tpu.memory_space<vmem>>, vector<1x1x16x16xf32>
    %118 = vector.shape_cast %117 : vector<1x1x16x16xf32> to vector<16x16xf32>
    %cst_98 = arith.constant dense<0.000000e+00> : vector<16x128xf32>
    %119 = tpu.matmul %118, %2, %cst_98 {dimension_numbers = #tpu.dot_dimension_numbers<[1], [0], [0], [1], [0, 0, 1, 1], [], []>} : vector<16x16xf32>, vector<16x128xf32>, vector<16x128xf32> -> vector<16x128xf32>
    %120 = tpu.concatenate %119, %119, %119, %119, %119, %119, %119, %119 in 0 : vector<16x128xf32>, vector<16x128xf32>, vector<16x128xf32>, vector<16x128xf32>, vector<16x128xf32>, vector<16x128xf32>, vector<16x128xf32>, vector<16x128xf32> -> vector<128x128xf32>
    %121 = arith.mulf %120, %3 : vector<128x128xf32>
    %122 = vector.extract_strided_slice %101 {offsets = [16, 0], sizes = [8, 128], strides = [1, 1]} : vector<24x128xf32> to vector<8x128xf32>
    %cst_99 = arith.constant dense<0.000000e+00> : vector<8x128xf32>
    %123 = tpu.matmul %122, %121, %cst_99 {dimension_numbers = #tpu.dot_dimension_numbers<[1], [0], [0], [1], [0, 0, 1, 1], [], []>} : vector<8x128xf32>, vector<128x128xf32>, vector<8x128xf32> -> vector<8x128xf32>
    %124 = arith.addf %116, %123 : vector<8x128xf32>
    %c3_100 = arith.constant 3 : index
    %c0_101 = arith.constant 0 : index
    %c0_102 = arith.constant 0 : index
    %125 = vector.load %arg7[%c3_100, %c0_101, %c0_102] : memref<4x8x128xf32, #tpu.memory_space<vmem>>, vector<1x8x128xf32>
    %126 = vector.shape_cast %125 : vector<1x8x128xf32> to vector<8x128xf32>
    %127 = vector.shape_cast %124 : vector<8x128xf32> to vector<1x8x128xf32>
    tpu.vector_store %arg7[%c3_100, %c0_101, %c0_102], %127 {strides = array<i32>} : memref<4x8x128xf32, #tpu.memory_space<vmem>>, vector<1x8x128xf32>,
    return
  }
  func.func @transform_0(%arg0: i32) -> (i32, i32, i32) {
    %c0_i32 = arith.constant 0 : i32
    %c0_i32_0 = arith.constant 0 : i32
    %c0_i32_1 = arith.constant 0 : i32
    return %arg0, %c0_i32, %c0_i32_0 : i32, i32, i32
  }
  func.func @transform_1(%arg0: i32) -> (i32, i32, i32, i32) {
    %c0_i32 = arith.constant 0 : i32
    %c0_i32_0 = arith.constant 0 : i32
    %c0_i32_1 = arith.constant 0 : i32
    %c0_i32_2 = arith.constant 0 : i32
    return %arg0, %c0_i32, %c0_i32_0, %c0_i32_1 : i32, i32, i32, i32
  }
  func.func @transform_2(%arg0: i32) -> (i32, i32) {
    %c0_i32 = arith.constant 0 : i32
    %c0_i32_0 = arith.constant 0 : i32
    %c0_i32_1 = arith.constant 0 : i32
    return %c0_i32, %c0_i32_0 : i32, i32
  }
  func.func @transform_3(%arg0: i32) -> (i32, i32) {
    %c0_i32 = arith.constant 0 : i32
    %c0_i32_0 = arith.constant 0 : i32
    %c0_i32_1 = arith.constant 0 : i32
    return %c0_i32, %c0_i32_0 : i32, i32
  }
  func.func @transform_4(%arg0: i32) -> (i32, i32) {
    %c0_i32 = arith.constant 0 : i32
    %c0_i32_0 = arith.constant 0 : i32
    %c0_i32_1 = arith.constant 0 : i32
    return %c0_i32, %c0_i32_0 : i32, i32
  }
  func.func @transform_5(%arg0: i32) -> (i32, i32) {
    %c0_i32 = arith.constant 0 : i32
    %c0_i32_0 = arith.constant 0 : i32
    %c0_i32_1 = arith.constant 0 : i32
    return %c0_i32, %c0_i32_0 : i32, i32
  }
  func.func @transform_6(%arg0: i32) -> (i32, i32, i32) {
    %c0_i32 = arith.constant 0 : i32
    %c0_i32_0 = arith.constant 0 : i32
    %c0_i32_1 = arith.constant 0 : i32
    return %arg0, %c0_i32, %c0_i32_0 : i32, i32, i32
  }
}

</mosaic_0001>

<bundles_post_ra>
// kernel: tile.9
= control target key start
LH: loop header
LB: loop body
LE: loop exit
PB: predicated region body
PF: predicated region fallthrough
CT: control target
= control target key end

     0   :  { %vm4_vm0 = vcmask 1047556   ;;  %s209_s14 = smov 96   ;;  %s210_s15 = smov 112   ;;  %vm6_vm1 = vcmask 130048   ;;  %vm25_vm2 = vcmask 1048448   ;;  %vm46_vm3 = vcmask 917248   ;;  %s386_s0 = inlined_call_operand.vmem [shape: f32[16,8,16], index: 0, kind: input, shape index: {}]   ;;  %s387_s1 = inlined_call_operand.vmem [shape: f32[16,128], index: 1, kind: output, shape index: {}]  }
   0x1   :  { %v172_v0 = vld [vmem:[%s386_s0 + $0x6] ss:$8 sm:$0xf]   ;;  %v167_v3 = vld [vmem:[%s386_s0 + $0x7] ss:$8 sm:$0xf]  }
   0x2   :  { %v173_v1 = vld [vmem:[%s386_s0 + $0x6] ss:$8 sm:$0xf0]   ;;  %v168_v4 = vld [vmem:[%s386_s0 + $0x7] ss:$8 sm:$0xf0]  }
   0x3   :  { %v43_v2 = vsel %vm4_vm0, %v173_v1, %v172_v0  ;;  %v22_v5 = vsel %vm4_vm0, %v168_v4, %v167_v3  ;;  %v174_v6 = vld [vmem:[%s386_s0 + $0x46] ss:$8 sm:$0xf]   ;;  %v169_v8 = vld [vmem:[%s386_s0 + $0x47] ss:$8 sm:$0xf]  }
   0x4   :  { %44 = vrot.lane.b32.xlu1 %v43_v2, %s209_s14  ;;  %23 = vrot.lane.b32.xlu0 %v22_v5, %s210_s15  ;;  %v175_v7 = vld [vmem:[%s386_s0 + $0x46] ss:$8 sm:$0xf0]   ;;  %v170_v9 = vld [vmem:[%s386_s0 + $0x47] ss:$8 sm:$0xf0]  }
   0x5   :  { %v53_v10 = vsel %vm4_vm0, %v175_v7, %v174_v6  ;;  %v32_v11 = vsel %vm4_vm0, %v170_v9, %v169_v8  ;;  %v177_v12 = vld [vmem:[%s386_s0 + $0x5] ss:$8 sm:$0xf]   ;;  %v184_v15 = vld [vmem:[%s386_s0 + $0x44] ss:$8 sm:$0xf]  }
   0x6   :  { %v178_v13 = vld [vmem:[%s386_s0 + $0x5] ss:$8 sm:$0xf0]   ;;  %v185_v16 = vld [vmem:[%s386_s0 + $0x44] ss:$8 sm:$0xf0]  }
   0x7   :  { %v64_v14 = vsel %vm4_vm0, %v178_v13, %v177_v12  ;;  %s211_s3 = smov 80   ;;  %v182_v17 = vld [vmem:[%s386_s0 + $0x4] ss:$8 sm:$0xf]   ;;  %v95_v21 = vsel %vm4_vm0, %v185_v16, %v184_v15  ;;  %s212_s12 = smov 64   ;;  %vm67_vm4 = vcmask 786048  }
   0x8   :  { %65 = vrot.lane.b32.xlu2 %v64_v14, %s211_s3  ;;  %v183_v18 = vld [vmem:[%s386_s0 + $0x4] ss:$8 sm:$0xf0]   ;;  %v179_v19 = vld [vmem:[%s386_s0 + $0x45] ss:$8 sm:$0xf]  }
   0x9   :  { %v180_v20 = vld [vmem:[%s386_s0 + $0x45] ss:$8 sm:$0xf0]   ;;  %v85_v22 = vsel %vm4_vm0, %v183_v18, %v182_v17  ;;  %v192_v24 = vld [vmem:[%s386_s0 + $0x2] ss:$8 sm:$0xf]  }
   0xa   :  { %v74_v23 = vsel %vm4_vm0, %v180_v20, %v179_v19  ;;  %v193_v25 = vld [vmem:[%s386_s0 + $0x2] ss:$8 sm:$0xf0]   ;;  %v189_v26 = vld [vmem:[%s386_s0 + $0x43] ss:$8 sm:$0xf]  }
   0xb   :  { %v190_v27 = vld [vmem:[%s386_s0 + $0x43] ss:$8 sm:$0xf0]   ;;  %v127_v30 = vsel %vm4_vm0, %v193_v25, %v192_v24  ;;  %s213_s25 = smov 32   ;;  %s214_s26 = smov 48   ;;  %vm88_vm5 = vcmask 654848  }
   0xc   :  { %54 = vrot.lane.b32.xlu1 %v53_v10, %s209_s14  ;;  %33 = vrot.lane.b32.xlu0 %v32_v11, %s210_s15  ;;  %v187_v28 = vld [vmem:[%s386_s0 + $0x3] ss:$8 sm:$0xf]   ;;  %v116_v31 = vsel %vm4_vm0, %v190_v27, %v189_v26  ;;  %v199_v33 = vld [vmem:[%s386_s0 + $0x41] ss:$8 sm:$0xf]  }
   0xd   :  { %v188_v29 = vld [vmem:[%s386_s0 + $0x3] ss:$8 sm:$0xf0]   ;;  %v200_v34 = vld [vmem:[%s386_s0 + $0x41] ss:$8 sm:$0xf0]  }
   0xe   :  { %v106_v32 = vsel %vm4_vm0, %v188_v29, %v187_v28  ;;  %v197_v35 = vld [vmem:[%s386_s0 + $0x1] ss:$8 sm:$0xf]   ;;  %v194_v37 = vld [vmem:[%s386_s0 + $0x42] ss:$8 sm:$0xf]   ;;  %v158_v39 = vsel %vm4_vm0, %v200_v34, %v199_v33 }
   0xf   :  { %v198_v36 = vld [vmem:[%s386_s0 + $0x1] ss:$8 sm:$0xf0]   ;;  %v195_v38 = vld [vmem:[%s386_s0 + $0x42] ss:$8 sm:$0xf0]  }
  0x10   :  { %75 = vrot.lane.b32.xlu2 %v74_v23, %s211_s3  ;;  %v148_v40 = vsel %vm4_vm0, %v198_v36, %v197_v35  ;;  %v137_v41 = vsel %vm4_vm0, %v195_v38, %v194_v37  ;;  %s215_s10 = smov 16   ;;  %v2_v42 = vld [vmem:[%s386_s0] ss:$8 sm:$0xf]   ;;  %vm109_vm6 = vcmask 523648   ;;  %vm130_vm7 = vcmask 392448  }
  0x11   :  { %v3_v43 = vld [vmem:[%s386_s0] ss:$8 sm:$0xf0]   ;;  %vm151_vm8 = vcmask 261248  }
  0x12   :  { %v5_v44 = vsel %vm4_vm0, %v3_v43, %v2_v42  ;;  %v164_v45 = vld [vmem:[%s386_s0 + $0x40] ss:$8 sm:$0xf]  }
  0x13   :  { %7 = vst.msk [vmem:[%s387_s1] sm:$0xff] %vm6_vm1, %v5_v44   ;;  %v165_v46 = vld [vmem:[%s386_s0 + $0x40] ss:$8 sm:$0xf0]  }
  0x14   :  { %96 = vrot.lane.b32.xlu1 %v95_v21, %s212_s12  ;;  %86 = vrot.lane.b32.xlu0 %v85_v22, %s212_s12  ;;  %v13_v47 = vsel %vm4_vm0, %v165_v46, %v164_v45 }
  0x15   :  { %166 = vst.msk [vmem:[%s387_s1 + $0x8] sm:$0xff] %vm6_vm1, %v13_v47  }
  0x18   :  { %107 = vrot.lane.b32.xlu2 %v106_v32, %s214_s26 }
  0x1c   :  { %128 = vrot.lane.b32.xlu1 %v127_v30, %s213_s25  ;;  %117 = vrot.lane.b32.xlu0 %v116_v31, %s214_s26 }
  0x20   :  { %138 = vrot.lane.b32.xlu2 %v137_v41, %s213_s25 }
  0x24   :  { %159 = vrot.lane.b32.xlu1 %v158_v39, %s215_s10  ;;  %149 = vrot.lane.b32.xlu0 %v148_v40, %s215_s10 }
  0x62   :  { %v66_v48 = vpop.permute.xlu2 %65  }
  0x6a   :  { %v76_v49 = vpop.permute.xlu2 %75  }
  0x72   :  { %v108_v52 = vpop.permute.xlu2 %107  }
  0x76   :  { %v45_v50 = vpop.permute.xlu1 %44   ;;  %v24_v51 = vpop.permute.xlu0 %23  }
  0x77   :  { %26 = vst.msk [vmem:[%s387_s1] sm:$0xff] %vm25_vm2, %v24_v51  }
  0x78   :  { %47 = vst.msk [vmem:[%s387_s1] sm:$0xff] %vm46_vm3, %v45_v50  }
  0x79   :  { %68 = vst.msk [vmem:[%s387_s1] sm:$0xff] %vm67_vm4, %v66_v48  }
  0x7a   :  { %v139_v55 = vpop.permute.xlu2 %138  }
  0x7e   :  { %v55_v53 = vpop.permute.xlu1 %54   ;;  %v34_v54 = vpop.permute.xlu0 %33  }
  0x7f   :  { %171 = vst.msk [vmem:[%s387_s1 + $0x8] sm:$0xff] %vm25_vm2, %v34_v54  }
  0x80   :  { %176 = vst.msk [vmem:[%s387_s1 + $0x8] sm:$0xff] %vm46_vm3, %v55_v53  }
  0x81   :  { %181 = vst.msk [vmem:[%s387_s1 + $0x8] sm:$0xff] %vm67_vm4, %v76_v49  }
  0x86   :  { %v97_v56 = vpop.permute.xlu1 %96   ;;  %v87_v57 = vpop.permute.xlu0 %86  }
  0x87   :  { %186 = vst.msk [vmem:[%s387_s1 + $0x8] sm:$0xff] %vm88_vm5, %v97_v56  }
  0x88   :  { %89 = vst.msk [vmem:[%s387_s1] sm:$0xff] %vm88_vm5, %v87_v57  }
  0x89   :  { %110 = vst.msk [vmem:[%s387_s1] sm:$0xff] %vm109_vm6, %v108_v52  }
  0x8e   :  { %v129_v58 = vpop.permute.xlu1 %128   ;;  %v118_v59 = vpop.permute.xlu0 %117  }
  0x8f   :  { %131 = vst.msk [vmem:[%s387_s1] sm:$0xff] %vm130_vm7, %v129_v58  }
  0x90   :  { %191 = vst.msk [vmem:[%s387_s1 + $0x8] sm:$0xff] %vm109_vm6, %v118_v59  }
  0x91   :  { %196 = vst.msk [vmem:[%s387_s1 + $0x8] sm:$0xff] %vm130_vm7, %v139_v55  }
  0x96   :  { %v160_v60 = vpop.permute.xlu1 %159   ;;  %v150_v61 = vpop.permute.xlu0 %149  }
  0x97   :  { %201 = vst.msk [vmem:[%s387_s1 + $0x8] sm:$0xff] %vm151_vm8, %v160_v60  }
  0x98   :  { %152 = vst.msk [vmem:[%s387_s1] sm:$0xff] %vm151_vm8, %v150_v61  }

// kernel: hetero_graph_conv.1
= control target key start
LH: loop header
LB: loop body
LE: loop exit
PB: predicated region body
PF: predicated region fallthrough
CT: control target
= control target key end

     0   :  { %s1485_s21 = smov 0   ;;  %s2114_s0 = inlined_call_operand.vmem [shape: f32[8,4,128], index: 0, kind: input, shape index: {}]   ;;  %s2115_s1 = inlined_call_operand.vmem [shape: f32[8,3,16,16], index: 1, kind: input, shape index: {}]   ;;  %s2116_s2 = inlined_call_operand.vmem [shape: f32[24,4], index: 2, kind: input, shape index: {}]   ;;  %s2117_s3 = inlined_call_operand.vmem [shape: f32[24,1], index: 3, kind: input, shape index: {}]   ;;  %s2118_s4 = inlined_call_operand.vmem [shape: f32[16,128], index: 4, kind: input, shape index: {}]   ;;  %s2119_s5 = inlined_call_operand.vmem [shape: f32[128,128], index: 5, kind: input, shape index: {}]   ;;  %s2120_s6 = inlined_call_operand.vmem [shape: f32[8,8,128], index: 6, kind: output, shape index: {}]  }
   0x1 LB: > { %s1348_s22 = sadd.s32 4294967295, %s1447_s21   ;;  %p1352_p0 = scmp.ge.s32.totalorder %s1447_s21, 1  ;;  %s1447_s21 = sphi %s1485_s21, %s16_s21  }
   0x2   : > { %p225_p1 = scmp.lt.s32.totalorder %s1447_s21, 3 }
   0x4   : > { %p226_p2 = pnand %p1352_p0, %p225_p1 }
   0x5   : > { %s1353_s27 = sshll.u32 (!%p226_p2), %s1348_s22, 2 }
   0x6   : > { %229 = sbr.rel (%p226_p2) target bundleno = 878 (0x36e), region = 44  ;;  %p262_p3 = scmp.lt.s32.totalorder (!%p226_p2), %s1353_s27, 7 }
   0xb   : > { %v1496_v0 = vld [vmem:[%s2118_s4 + $0x8] sm:$0xff]  ;;  %v1501_v1 = vld [vmem:[%s2118_s4] sm:$0xff]  ;;  %s2122_s27 = smov (!%p262_p3, %s1353_s27), 7  ;;  %vm330_vm0 = vcmask 1043456   ;;  %vm362_vm1 = vcmask 130048   ;;  %vm320_vm2 = vcmask 31744  }
   0xc   : > { %383 = vmatpush.msra.mxu1 %v1496_v0  ;;  %431 = vmatpush.msra.mxu2 %v1496_v0  ;;  %s1429_s28 = smul.u32 48, %s2122_s27  ;;  %s1354_s29 = sshll.u32 %s2122_s27, 2  ;;  %v1527_v3 = vld [vmem:[%s2116_s2] sm:$0xff]  ;;  %v284_v7 = vld [vmem:[%s2117_s3 + $0x8] sm:$0xff]  ;;  %v1449_v8 = vmov 0   ;;  %v285_v13 = vld [vmem:[%s2117_s3 + $0x10] sm:$0xff] }
   0xd   : > { %s1516_s8 = scalar_lea.vmem %s2114_s0, %s1354_s29  ;;  %1439 = vset.pattern.permute.xlu0 %v1449_v8  ;;  %1440 = vset.pattern.permute.xlu1 %v1449_v8  ;;  %v1546_v11 = vld [vmem:[%s2116_s2 + $0x8] sm:$0xff]  ;;  %v283_v12 = vld [vmem:[%s2117_s3] sm:$0xff]  ;;  %v1562_v15 = vld [vmem:[%s2116_s2 + $0x10] sm:$0xff]  ;;  %s1358_s16 = sshll.u32 %s2122_s27, 3 }
   0xe   : > { %384 = vmatpush.msra.mxu1 %v1501_v1  ;;  %432 = vmatpush.msra.mxu2 %v1501_v1  ;;  %s1521_s11 = scalar_lea.vmem %s2115_s1, %s1429_s28  ;;  %v304_v2 = vld [vmem:[%s1516_s8] sm:$0xf]  ;;  %v1373_v4 = vld [vmem:[%s1516_s8 + $0x4] sm:$0xf]  ;;  %v1582_v19 = vld [vmem:[%s2119_s5 + $0x78] sm:$0xff]  ;;  %s1808_s19 = scalar_lea.vmem %s2120_s6, %s1358_s16 }
   0xf   : > { %v360_v5 = vld [vmem:[%s1521_s11] sm:$0xff]  ;;  %v1365_v6 = vld [vmem:[%s1521_s11 + $0x10] sm:$0xff]  ;;  %1359 = vmatpush.msk.msra.mxu3 %vm330_vm0, %v304_v2  ;;  %312 = vperm.xlu0 %1439, %v284_v7   ;;  %v361_v9 = vld [vmem:[%s1521_s11 + $0x8] sm:$0xff] }
  0x10   : > { %519 = vmatpush.msrb.mxu1 %v1496_v0  ;;  %1367 = vmatmul.msk.f32.vlgmr.msra.gmra.mxu2 %vm362_vm1, %v1365_v6  ;;  %v1366_v10 = vld [vmem:[%s1521_s11 + $0x18] sm:$0xff]  ;;  %v1369_v14 = vld [vmem:[%s1521_s11 + $0x20] sm:$0xff]  ;;  %v1370_v16 = vld [vmem:[%s1521_s11 + $0x28] sm:$0xff] }
  0x11   : > { %1363 = vmatmul.msk.f32.vlgmr.msra.gmra.mxu1 %vm362_vm1, %v360_v5  ;;  %1360 = vmatmul.msk.f32.vlgmr.msra.gmra.mxu3 %vm320_vm2, %v1527_v3  ;;  %v1589_v21 = vld [vmem:[%s2119_s5 + $0x70] sm:$0xff]  ;;  %v1594_v22 = vld [vmem:[%s2119_s5 + $0x68] sm:$0xff]  ;;  %v1605_v26 = vld [vmem:[%s2119_s5 + $0x60] sm:$0xff] }
  0x12   : > { %520 = vmatpush.msrb.mxu1 %v1501_v1  ;;  %317 = vperm.xlu1 %1440, %v285_v13   ;;  %v1614_v29 = vld [vmem:[%s2119_s5 + $0x58] sm:$0xff]  ;;  %v1625_v33 = vld [vmem:[%s2119_s5 + $0x50] sm:$0xff]  ;;  %v1634_v36 = vld [vmem:[%s2119_s5 + $0x48] sm:$0xff] }
  0x13   : > { %v1643_v39 = vld [vmem:[%s2119_s5 + $0x40] sm:$0xff]  ;;  %v1652_v42 = vld [vmem:[%s2119_s5 + $0x38] sm:$0xff]  ;;  %v1663_v46 = vld [vmem:[%s2119_s5 + $0x30] sm:$0xff] }
  0x14   : > { %1374 = vmatpush.msk.msra.mxu1 %vm330_vm0, %v1373_v4  ;;  %v1676_v51 = vld [vmem:[%s2119_s5 + $0x28] sm:$0xff]  ;;  %v1689_v56 = vld [vmem:[%s2119_s5 + $0x20] sm:$0xff]  ;;  %v1700_v60 = vld [vmem:[%s2119_s5 + $0x18] sm:$0xff] }
  0x15   : > { %v1711_v4 = vld [vmem:[%s2119_s5 + $0x10] sm:$0xff]  ;;  %v1722_v8 = vld [vmem:[%s2119_s5 + $0x8] sm:$0xff]  ;;  %v1733_v13 = vld [vmem:[%s2119_s5] sm:$0xff] }
  0x17   : > { %307 = vperm.xlu0 %1439, %v283_v12  }
  0x18   : > { %1368 = vmatmul.msk.f32.gmra.mxu2 %vm362_vm1, %v1366_v10 }
  0x19   : > { %1364 = vmatmul.msk.f32.gmra.mxu1 %vm362_vm1, %v361_v9  ;;  %1361 = vmatmul.msk.f32.gmra.mxu3 %vm320_vm2, %v1546_v11 }
  0x21   : > { %1371 = vmatmul.msk.f32.vlgmr.msrb.gmra.mxu1 %vm362_vm1, %v1369_v14  ;;  %1362 = vmatmul.msk.f32.gmra.mxu3 %vm320_vm2, %v1562_v15 }
  0x29   : > { %1372 = vmatmul.msk.f32.gmra.mxu1 %vm362_vm1, %v1370_v16 }
  0x31   : > { %1375 = vmatmul.msk.f32.vlgmr.msra.gmra.mxu1 %vm320_vm2, %v1527_v3 }
  0x39   : > { %1376 = vmatmul.msk.f32.gmra.mxu1 %vm320_vm2, %v1546_v11 }
  0x41   : > { %1377 = vmatmul.msk.f32.gmra.mxu1 %vm320_vm2, %v1562_v15 }
  0x81   : > { %v1678_v52 = vpop.permute.xlu0 %312 }
  0x89   : > { %v1735_v14 = vpop.permute.xlu0 %307 }
  0x8e   : > { %v1575_v17 = vpop.f32.mrf.mxu1 }
  0x8f   : > { %v406_v24 = vmul.f32 %v1575_v17, %v1589_v21  ;;  %v404_v27 = vmul.f32 %v1575_v17, %v1605_v26  ;;  %v402_v35 = vmul.f32 %v1575_v17, %v1625_v33  ;;  %v400_v41 = vmul.f32 %v1575_v17, %v1643_v39 }
  0x90   : > { %v398_v49 = vmul.f32 %v1575_v17, %v1663_v46  ;;  %v396_v58 = vmul.f32 %v1575_v17, %v1689_v56  ;;  %v394_v6 = vmul.f32 %v1575_v17, %v1711_v4 }
  0x93   : > { %v1577_v18 = vpop.f32.mrf.mxu2 }
  0x94   : > { %v454_v34 = vmul.f32 %v1577_v18, %v1589_v21  ;;  %v452_v40 = vmul.f32 %v1577_v18, %v1605_v26  ;;  %v450_v47 = vmul.f32 %v1577_v18, %v1625_v33  ;;  %v448_v57 = vmul.f32 %v1577_v18, %v1643_v39  ;;  %v351_v63 = vpop.f32.mrf.mxu3 }
  0x95   : > { %v446_v5 = vmul.f32 %v1577_v18, %v1663_v46  ;;  %v444_v16 = vmul.f32 %v1577_v18, %v1689_v56 }
  0x96   : > { %v1584_v20 = vpop.f32.mrf.mxu1 }
  0x97   : > { %v407_v23 = vmul.f32 %v1584_v20, %v1582_v19  ;;  %v405_v25 = vmul.f32 %v1584_v20, %v1594_v22  ;;  %v403_v31 = vmul.f32 %v1584_v20, %v1614_v29  ;;  %v401_v38 = vmul.f32 %v1584_v20, %v1634_v36 }
  0x98   : > { %v399_v44 = vmul.f32 %v1584_v20, %v1652_v42  ;;  %v397_v54 = vmul.f32 %v1584_v20, %v1676_v51  ;;  %v395_v62 = vmul.f32 %v1584_v20, %v1700_v60  ;;  %v393_v10 = vmul.f32 %v1584_v20, %v1722_v8 }
  0x99   : > { %476 = vmatpush.msra.mxu0 %v407_v23  ;;  %v392_v23 = vmul.f32 %v1575_v17, %v1733_v13  ;;  %v442_v17 = vmul.f32 %v1577_v18, %v1711_v4 }
  0x9b   : > { %477 = vmatpush.msra.mxu0 %v406_v24  ;;  %v1609_v28 = vpop.f32.mrf.mxu2 }
  0x9c   : > { %v455_v30 = vmul.f32 %v1609_v28, %v1582_v19  ;;  %v453_v37 = vmul.f32 %v1609_v28, %v1594_v22  ;;  %v451_v43 = vmul.f32 %v1609_v28, %v1614_v29  ;;  %v449_v53 = vmul.f32 %v1609_v28, %v1634_v36 }
  0x9d   : > { %478 = vmatpush.msra.mxu0 %v405_v25  ;;  %v447_v61 = vmul.f32 %v1609_v28, %v1652_v42  ;;  %v445_v9 = vmul.f32 %v1609_v28, %v1676_v51  ;;  %v443_v24 = vmul.f32 %v1609_v28, %v1700_v60  ;;  %v352_v25 = vadd.f32 %v351_v63, %v1735_v14 }
  0x9e   : > { %v1620_v32 = vpop.f32.mrf.mxu1  ;;  %456 = vmatpush.msrb.mxu3 %v455_v30  ;;  %v354_v30 = vpop.f32.mrf.mxu3 }
  0x9f   : > { %479 = vmatpush.msra.mxu0 %v404_v27  ;;  %v542_v50 = vmul.f32 %v1620_v32, %v1589_v21  ;;  %v540_v59 = vmul.f32 %v1620_v32, %v1605_v26  ;;  %v538_v7 = vmul.f32 %v1620_v32, %v1625_v33  ;;  %v536_v20 = vmul.f32 %v1620_v32, %v1643_v39 }
  0xa0   : > { %457 = vmatpush.msrb.mxu3 %v454_v34  ;;  %v441_v34 = vmul.f32 %v1609_v28, %v1722_v8  ;;  %v1382_v28 = vld [vmem:[%s1521_s11 + $0x40] sm:$0xff] }
  0xa1   : > { %480 = vmatpush.msra.mxu0 %v403_v31  ;;  %v534_v31 = vmul.f32 %v1620_v32, %v1663_v46 }
  0xa2   : > { %458 = vmatpush.msrb.mxu3 %v453_v37 }
  0xa3   : > { %481 = vmatpush.msra.mxu0 %v402_v35  ;;  %v355_v35 = vadd.f32 %v354_v30, %v1678_v52 }
  0xa4   : > { %459 = vmatpush.msrb.mxu3 %v452_v40  ;;  %v532_v40 = vmul.f32 %v1620_v32, %v1689_v56 }
  0xa5   : > { %482 = vmatpush.msra.mxu0 %v401_v38  ;;  %v440_v38 = vmul.f32 %v1577_v18, %v1733_v13  ;;  %v530_v18 = vmul.f32 %v1620_v32, %v1711_v4 }
  0xa6   : > { %v1658_v45 = vpop.f32.mrf.mxu1  ;;  %460 = vmatpush.msrb.mxu3 %v451_v43  ;;  %v1771_v43 = vpop.permute.xlu1 %317 }
  0xa7   : > { %483 = vmatpush.msra.mxu0 %v400_v41  ;;  %v543_v48 = vmul.f32 %v1658_v45, %v1582_v19  ;;  %v541_v55 = vmul.f32 %v1658_v45, %v1594_v22  ;;  %v539_v2 = vmul.f32 %v1658_v45, %v1614_v29  ;;  %v537_v12 = vmul.f32 %v1658_v45, %v1634_v36 }
  0xa8   : > { %461 = vmatpush.msrb.mxu3 %v450_v47  ;;  %v535_v27 = vmul.f32 %v1658_v45, %v1652_v42  ;;  %v533_v37 = vmul.f32 %v1658_v45, %v1676_v51  ;;  %v531_v41 = vmul.f32 %v1658_v45, %v1700_v60  ;;  %v529_v47 = vmul.f32 %v1658_v45, %v1722_v8  ;;  %v1379_v45 = vld [vmem:[%s1521_s11 + $0x38] sm:$0xff] }
  0xa9   : > { %484 = vmatpush.msra.mxu0 %v399_v44  ;;  %544 = vmatpush.msrb.mxu2 %v543_v48  ;;  %v357_v44 = vpop.f32.mrf.mxu3  ;;  %v1378_v48 = vld [vmem:[%s1521_s11 + $0x30] sm:$0xff] }
  0xaa   : > { %462 = vmatpush.msrb.mxu3 %v449_v53  ;;  %v358_v53 = vadd.f32 %v357_v44, %v1771_v43 }
  0xab   : > { %485 = vmatpush.msra.mxu0 %v398_v49  ;;  %545 = vmatpush.msrb.mxu2 %v542_v50  ;;  %v528_v49 = vmul.f32 %v1620_v32, %v1733_v13  ;;  %v1391_v50 = vld [vmem:[%s1516_s8 + $0x8] sm:$0xf]  ;;  %v1387_v32 = vld [vmem:[%s1521_s11 + $0x58] sm:$0xff] }
  0xac   : > { %463 = vmatpush.msrb.mxu3 %v448_v57 }
  0xad   : > { %486 = vmatpush.msra.mxu0 %v397_v54  ;;  %546 = vmatpush.msrb.mxu2 %v541_v55  ;;  %v1383_v54 = vld [vmem:[%s1521_s11 + $0x48] sm:$0xff]  ;;  %v1386_v55 = vld [vmem:[%s1521_s11 + $0x50] sm:$0xff] }
  0xae   : > { %464 = vmatpush.msrb.mxu3 %v447_v61 }
  0xaf   : > { %487 = vmatpush.msra.mxu0 %v396_v58  ;;  %547 = vmatpush.msrb.mxu2 %v540_v59 }
  0xb0   : > { %465 = vmatpush.msrb.mxu3 %v446_v5 }
  0xb1   : > { %488 = vmatpush.msra.mxu0 %v395_v62  ;;  %548 = vmatpush.msrb.mxu2 %v539_v2 }
  0xb2   : > { %466 = vmatpush.msrb.mxu3 %v445_v9 }
  0xb3   : > { %489 = vmatpush.msra.mxu0 %v394_v6  ;;  %549 = vmatpush.msrb.mxu2 %v538_v7 }
  0xb4   : > { %467 = vmatpush.msrb.mxu3 %v444_v16 }
  0xb5   : > { %490 = vmatpush.msra.mxu0 %v393_v10  ;;  %550 = vmatpush.msrb.mxu2 %v537_v12 }
  0xb6   : > { %468 = vmatpush.msrb.mxu3 %v443_v24 }
  0xb7   : > { %491 = vmatpush.msra.mxu0 %v392_v23  ;;  %551 = vmatpush.msrb.mxu2 %v536_v20 }
  0xb8   : > { %492 = vmatmul.f32.vlgmr.msra.gmra.mxu0 %v352_v25  ;;  %469 = vmatpush.msrb.mxu3 %v442_v17 }
  0xb9   : > { %668 = vmatpush.msrb.mxu0 %v1496_v0  ;;  %552 = vmatpush.msrb.mxu2 %v535_v27 }
  0xba   : > { %470 = vmatpush.msrb.mxu3 %v441_v34  ;;  %v1825_v34 = vpop.f32.mrf.mxu1 }
  0xbb   : > { %669 = vmatpush.msrb.mxu0 %v1501_v1  ;;  %553 = vmatpush.msrb.mxu2 %v534_v31 }
  0xbc   : > { %471 = vmatpush.msrb.mxu3 %v440_v38 }
  0xbd   : > { %554 = vmatpush.msrb.mxu2 %v533_v37  ;;  %472 = vmatmul.f32.vlgmr.msrb.gmra.mxu3 %v355_v35 }
  0xbe   : > { %620 = vmatpush.msra.mxu3 %v1496_v0 }
  0xbf   : > { %555 = vmatpush.msrb.mxu2 %v532_v40 }
  0xc0   : > { %1384 = vmatmul.msk.f32.vlgmr.msrb.gmra.mxu0 %vm362_vm1, %v1382_v28  ;;  %621 = vmatpush.msra.mxu3 %v1501_v1 }
  0xc1   : > { %556 = vmatpush.msrb.mxu2 %v531_v41 }
  0xc2   : > { %756 = vmatpush.msrb.mxu3 %v1496_v0 }
  0xc3   : > { %557 = vmatpush.msrb.mxu2 %v530_v18 }
  0xc4   : > { %757 = vmatpush.msrb.mxu3 %v1501_v1 }
  0xc5   : > { %558 = vmatpush.msrb.mxu2 %v529_v47  ;;  %1380 = vmatmul.msk.f32.vlgmr.msra.gmra.mxu3 %vm362_vm1, %v1378_v48 }
  0xc6   : > { %1392 = vmatpush.msk.msra.mxu3 %vm330_vm0, %v1391_v50 }
  0xc7   : > { %559 = vmatpush.msrb.mxu2 %v528_v49 }
  0xc8   : > { %1385 = vmatmul.msk.f32.gmra.mxu0 %vm362_vm1, %v1383_v54  ;;  %560 = vmatmul.f32.vlgmr.msrb.gmra.mxu2 %v358_v53  ;;  %v591_v53 = vpop.f32.mrf.mxu1 }
  0xcd   : > { %1381 = vmatmul.msk.f32.gmra.mxu3 %vm362_vm1, %v1379_v45 }
  0xd5   : > { %1388 = vmatmul.msk.f32.vlgmr.msrb.gmra.mxu3 %vm362_vm1, %v1386_v55 }
  0xdd   : > { %1389 = vmatmul.msk.f32.gmra.mxu3 %vm362_vm1, %v1387_v32 }
  0xe5   : > { %1393 = vmatmul.msk.f32.vlgmr.msra.gmra.mxu3 %vm320_vm2, %v1527_v3 }
  0xed   : > { %1394 = vmatmul.msk.f32.gmra.mxu3 %vm320_vm2, %v1546_v11 }
  0xf5   : > { %1395 = vmatmul.msk.f32.gmra.mxu3 %vm320_vm2, %v1562_v15 }
 0x135   : > { %v493_v57 = vpop.f32.mrf.mxu0 }
 0x13d   : > { %v671_v58 = vpop.f32.mrf.mxu0 }
 0x13e   : > { %v691_v63 = vmul.f32 %v671_v58, %v1589_v21  ;;  %v689_v6 = vmul.f32 %v671_v58, %v1605_v26  ;;  %v687_v16 = vmul.f32 %v671_v58, %v1625_v33  ;;  %v685_v25 = vmul.f32 %v671_v58, %v1643_v39 }
 0x13f   : > { %v683_v31 = vmul.f32 %v671_v58, %v1663_v46  ;;  %v681_v28 = vmul.f32 %v671_v58, %v1689_v56  ;;  %v679_v47 = vmul.f32 %v671_v58, %v1711_v4  ;;  %v677_v55 = vmul.f32 %v671_v58, %v1733_v13 }
 0x140   : > { %v473_v59 = vpop.f32.mrf.mxu3 }
 0x141   : > { %v494_v7 = vadd.f32 %v493_v57, %v473_v59  ;;  %v592_v59 = vadd.f32 %v591_v53, %v1678_v52 }
 0x145   : > { %v674_v61 = vpop.f32.mrf.mxu0 }
 0x146   : > { %v692_v62 = vmul.f32 %v674_v61, %v1582_v19  ;;  %v690_v2 = vmul.f32 %v674_v61, %v1594_v22  ;;  %v688_v10 = vmul.f32 %v674_v61, %v1614_v29  ;;  %v686_v23 = vmul.f32 %v674_v61, %v1634_v36 }
 0x147   : > { %v684_v17 = vmul.f32 %v674_v61, %v1652_v42  ;;  %v682_v37 = vmul.f32 %v674_v61, %v1676_v51  ;;  %v680_v18 = vmul.f32 %v674_v61, %v1700_v60  ;;  %v678_v49 = vmul.f32 %v674_v61, %v1722_v8 }
 0x148   : > { %693 = vmatpush.msrb.mxu1 %v692_v62  ;;  %v1801_v5 = vpop.f32.mrf.mxu3 }
 0x149   : > { %v643_v27 = vmul.f32 %v1801_v5, %v1589_v21  ;;  %v641_v35 = vmul.f32 %v1801_v5, %v1605_v26  ;;  %v639_v41 = vmul.f32 %v1801_v5, %v1625_v33  ;;  %v637_v48 = vmul.f32 %v1801_v5, %v1643_v39 }
 0x14a   : > { %694 = vmatpush.msrb.mxu1 %v691_v63  ;;  %v635_v57 = vmul.f32 %v1801_v5, %v1663_v46  ;;  %v633_v63 = vmul.f32 %v1801_v5, %v1689_v56 }
 0x14b   : > { %v561_v9 = vpop.f32.mrf.mxu2 }
 0x14c   : > { %695 = vmatpush.msrb.mxu1 %v690_v2  ;;  %v564_v12 = vadd.f32 %v561_v9, %v494_v7  ;;  %v631_v9 = vmul.f32 %v1801_v5, %v1711_v4 }
 0x14e   : > { %696 = vmatpush.msrb.mxu1 %v689_v6  ;;  %565 = vst [vmem:[%s1808_s19] sm:$0xff] %v564_v12 }
 0x150   : > { %697 = vmatpush.msrb.mxu1 %v688_v10  ;;  %v1814_v20 = vpop.f32.mrf.mxu3  ;;  %v1396_v10 = vld [vmem:[%s1521_s11 + $0x60] sm:$0xff] }
 0x151   : > { %v644_v24 = vmul.f32 %v1814_v20, %v1582_v19  ;;  %v642_v30 = vmul.f32 %v1814_v20, %v1594_v22  ;;  %v640_v40 = vmul.f32 %v1814_v20, %v1614_v29  ;;  %v638_v44 = vmul.f32 %v1814_v20, %v1634_v36 }
 0x152   : > { %698 = vmatpush.msrb.mxu1 %v687_v16  ;;  %v636_v54 = vmul.f32 %v1814_v20, %v1652_v42  ;;  %v634_v62 = vmul.f32 %v1814_v20, %v1676_v51  ;;  %v632_v6 = vmul.f32 %v1814_v20, %v1700_v60  ;;  %v1409_v16 = vld [vmem:[%s1516_s8 + $0xc] sm:$0xf] }
 0x153   : > { %713 = vmatpush.msra.mxu2 %v644_v24 }
 0x154   : > { %699 = vmatpush.msrb.mxu1 %v686_v23  ;;  %v630_v23 = vmul.f32 %v1814_v20, %v1722_v8 }
 0x155   : > { %714 = vmatpush.msra.mxu2 %v643_v27  ;;  %v589_v27 = vadd.f32 %v1825_v34, %v1735_v14  ;;  %v1400_v34 = vld [vmem:[%s1521_s11 + $0x70] sm:$0xff] }
 0x156   : > { %700 = vmatpush.msrb.mxu1 %v685_v25  ;;  %v629_v25 = vmul.f32 %v1801_v5, %v1733_v13  ;;  %v1397_v5 = vld [vmem:[%s1521_s11 + $0x68] sm:$0xff] }
 0x157   : > { %715 = vmatpush.msra.mxu2 %v642_v30 }
 0x158   : > { %701 = vmatpush.msrb.mxu1 %v684_v17  ;;  %v1830_v38 = vpop.f32.mrf.mxu3 }
 0x159   : > { %716 = vmatpush.msra.mxu2 %v641_v35  ;;  %v779_v32 = vmul.f32 %v1830_v38, %v1589_v21  ;;  %v777_v58 = vmul.f32 %v1830_v38, %v1605_v26  ;;  %v775_v7 = vmul.f32 %v1830_v38, %v1625_v33  ;;  %v773_v24 = vmul.f32 %v1830_v38, %v1643_v39 }
 0x15a   : > { %702 = vmatpush.msrb.mxu1 %v683_v31  ;;  %v771_v17 = vmul.f32 %v1830_v38, %v1663_v46  ;;  %v769_v31 = vmul.f32 %v1830_v38, %v1689_v56 }
 0x15b   : > { %717 = vmatpush.msra.mxu2 %v640_v40  ;;  %v1404_v40 = vld [vmem:[%s1521_s11 + $0x80] sm:$0xff] }
 0x15c   : > { %703 = vmatpush.msrb.mxu1 %v682_v37  ;;  %v767_v37 = vmul.f32 %v1830_v38, %v1711_v4 }
 0x15d   : > { %718 = vmatpush.msra.mxu2 %v639_v41  ;;  %v594_v41 = vpop.f32.mrf.mxu1 }
 0x15e   : > { %704 = vmatpush.msrb.mxu1 %v681_v28 }
 0x15f   : > { %719 = vmatpush.msra.mxu2 %v638_v44  ;;  %v1401_v44 = vld [vmem:[%s1521_s11 + $0x78] sm:$0xff] }
 0x160   : > { %705 = vmatpush.msrb.mxu1 %v680_v18  ;;  %v1844_v50 = vpop.f32.mrf.mxu3  ;;  %v765_v18 = vmul.f32 %v1830_v38, %v1733_v13 }
 0x161   : > { %720 = vmatpush.msra.mxu2 %v637_v48  ;;  %v780_v45 = vmul.f32 %v1844_v50, %v1582_v19  ;;  %v778_v61 = vmul.f32 %v1844_v50, %v1594_v22  ;;  %v776_v2 = vmul.f32 %v1844_v50, %v1614_v29  ;;  %v774_v12 = vmul.f32 %v1844_v50, %v1634_v36  ;;  %v1405_v48 = vld [vmem:[%s1521_s11 + $0x88] sm:$0xff] }
 0x162   : > { %706 = vmatpush.msrb.mxu1 %v679_v47  ;;  %v772_v20 = vmul.f32 %v1844_v50, %v1652_v42  ;;  %v770_v30 = vmul.f32 %v1844_v50, %v1676_v51  ;;  %v768_v35 = vmul.f32 %v1844_v50, %v1700_v60  ;;  %v766_v28 = vmul.f32 %v1844_v50, %v1722_v8 }
 0x163   : > { %721 = vmatpush.msra.mxu2 %v636_v54  ;;  %781 = vmatpush.msra.mxu0 %v780_v45  ;;  %v595_v47 = vadd.f32 %v594_v41, %v1771_v43 }
 0x164   : > { %707 = vmatpush.msrb.mxu1 %v678_v49 }
 0x165   : > { %722 = vmatpush.msra.mxu2 %v635_v57  ;;  %782 = vmatpush.msra.mxu0 %v779_v32 }
 0x166   : > { %708 = vmatpush.msrb.mxu1 %v677_v55 }
 0x167   : > { %709 = vmatmul.f32.vlgmr.msrb.gmra.mxu1 %v592_v59  ;;  %723 = vmatpush.msra.mxu2 %v634_v62 }
 0x168   : > { %858 = vmatpush.msra.mxu1 %v1496_v0  ;;  %783 = vmatpush.msra.mxu0 %v778_v61 }
 0x169   : > { %724 = vmatpush.msra.mxu2 %v633_v63 }
 0x16a   : > { %859 = vmatpush.msra.mxu1 %v1501_v1  ;;  %784 = vmatpush.msra.mxu0 %v777_v58 }
 0x16b   : > { %725 = vmatpush.msra.mxu2 %v632_v6 }
 0x16c   : > { %994 = vmatpush.msrb.mxu1 %v1496_v0  ;;  %785 = vmatpush.msra.mxu0 %v776_v2 }
 0x16d   : > { %726 = vmatpush.msra.mxu2 %v631_v9 }
 0x16e   : > { %995 = vmatpush.msrb.mxu1 %v1501_v1  ;;  %786 = vmatpush.msra.mxu0 %v775_v7 }
 0x16f   : > { %1398 = vmatmul.msk.f32.vlgmr.msra.gmra.mxu1 %vm362_vm1, %v1396_v10  ;;  %727 = vmatpush.msra.mxu2 %v630_v23 }
 0x170   : > { %1410 = vmatpush.msk.msra.mxu1 %vm330_vm0, %v1409_v16  ;;  %787 = vmatpush.msra.mxu0 %v774_v12 }
 0x171   : > { %728 = vmatpush.msra.mxu2 %v629_v25 }
 0x172   : > { %788 = vmatpush.msra.mxu0 %v773_v24  ;;  %729 = vmatmul.f32.vlgmr.msra.gmra.mxu2 %v589_v27 }
 0x173   : > { %906 = vmatpush.msrb.mxu2 %v1496_v0 }
 0x174   : > { %789 = vmatpush.msra.mxu0 %v772_v20 }
 0x175   : > { %907 = vmatpush.msrb.mxu2 %v1501_v1 }
 0x176   : > { %790 = vmatpush.msra.mxu0 %v771_v17 }
 0x177   : > { %1399 = vmatmul.msk.f32.gmra.mxu1 %vm362_vm1, %v1397_v5 }
 0x178   : > { %791 = vmatpush.msra.mxu0 %v770_v30 }
 0x17a   : > { %792 = vmatpush.msra.mxu0 %v769_v31  ;;  %1402 = vmatmul.msk.f32.vlgmr.msrb.gmra.mxu2 %vm362_vm1, %v1400_v34 }
 0x17c   : > { %793 = vmatpush.msra.mxu0 %v768_v35  ;;  %v826_v35 = vpop.f32.mrf.mxu3 }
 0x17e   : > { %794 = vmatpush.msra.mxu0 %v767_v37 }
 0x17f   : > { %1406 = vmatmul.msk.f32.vlgmr.msrb.gmra.mxu1 %vm362_vm1, %v1404_v40 }
 0x180   : > { %795 = vmatpush.msra.mxu0 %v766_v28 }
 0x182   : > { %796 = vmatpush.msra.mxu0 %v765_v18  ;;  %1403 = vmatmul.msk.f32.gmra.mxu2 %vm362_vm1, %v1401_v44 }
 0x183   : > { %797 = vmatmul.f32.vlgmr.msra.gmra.mxu0 %v595_v47 }
 0x187   : > { %1407 = vmatmul.msk.f32.gmra.mxu1 %vm362_vm1, %v1405_v48 }
 0x18f   : > { %1411 = vmatmul.msk.f32.vlgmr.msra.gmra.mxu1 %vm320_vm2, %v1527_v3 }
 0x197   : > { %1412 = vmatmul.msk.f32.gmra.mxu1 %vm320_vm2, %v1546_v11 }
 0x19f   : > { %1413 = vmatmul.msk.f32.gmra.mxu1 %vm320_vm2, %v1562_v15 }
 0x1e4   : > { %v710_v38 = vpop.f32.mrf.mxu1 }
 0x1ec   : > { %v1925_v49 = vpop.f32.mrf.mxu1 }
 0x1ed   : > { %v881_v54 = vmul.f32 %v1925_v49, %v1589_v21  ;;  %v879_v3 = vmul.f32 %v1925_v49, %v1605_v26  ;;  %v877_v32 = vmul.f32 %v1925_v49, %v1625_v33  ;;  %v875_v58 = vmul.f32 %v1925_v49, %v1643_v39 }
 0x1ee   : > { %v873_v9 = vmul.f32 %v1925_v49, %v1663_v46  ;;  %v871_v27 = vmul.f32 %v1925_v49, %v1689_v56  ;;  %v869_v34 = vmul.f32 %v1925_v49, %v1711_v4  ;;  %v867_v44 = vmul.f32 %v1925_v49, %v1733_v13 }
 0x1f4   : > { %v864_v50 = vpop.f32.mrf.mxu1 }
 0x1f5   : > { %v882_v53 = vmul.f32 %v864_v50, %v1582_v19  ;;  %v730_v45 = vpop.f32.mrf.mxu2  ;;  %v880_v55 = vmul.f32 %v864_v50, %v1594_v22  ;;  %v878_v11 = vmul.f32 %v864_v50, %v1614_v29  ;;  %v876_v59 = vmul.f32 %v864_v50, %v1634_v36 }
 0x1f6   : > { %v731_v61 = vadd.f32 %v730_v45, %v710_v38  ;;  %v874_v2 = vmul.f32 %v864_v50, %v1652_v42  ;;  %v872_v23 = vmul.f32 %v864_v50, %v1676_v51  ;;  %v870_v5 = vmul.f32 %v864_v50, %v1700_v60  ;;  %v829_v45 = vpop.f32.mrf.mxu3 }
 0x1f7   : > { %951 = vmatpush.msrb.mxu0 %v882_v53  ;;  %v868_v28 = vmul.f32 %v864_v50, %v1722_v8  ;;  %v827_v38 = vadd.f32 %v826_v35, %v1735_v14 }
 0x1f9   : > { %952 = vmatpush.msrb.mxu0 %v881_v54 }
 0x1fb   : > { %953 = vmatpush.msrb.mxu0 %v880_v55 }
 0x1fc   : > { %v1934_v15 = vpop.f32.mrf.mxu1 }
 0x1fd   : > { %954 = vmatpush.msrb.mxu0 %v879_v3  ;;  %v1938_v57 = vpop.f32.mrf.mxu2  ;;  %v1017_v12 = vmul.f32 %v1934_v15, %v1589_v21  ;;  %v1015_v20 = vmul.f32 %v1934_v15, %v1605_v26  ;;  %v1013_v37 = vmul.f32 %v1934_v15, %v1625_v33  ;;  %v1011_v47 = vmul.f32 %v1934_v15, %v1643_v39 }
 0x1fe   : > { %v929_v25 = vmul.f32 %v1938_v57, %v1589_v21  ;;  %v927_v31 = vmul.f32 %v1938_v57, %v1605_v26  ;;  %v925_v18 = vmul.f32 %v1938_v57, %v1625_v33  ;;  %v923_v49 = vmul.f32 %v1938_v57, %v1643_v39 }
 0x1ff   : > { %955 = vmatpush.msrb.mxu0 %v878_v11  ;;  %v1009_v53 = vmul.f32 %v1934_v15, %v1663_v46  ;;  %v921_v3 = vmul.f32 %v1938_v57, %v1663_v46  ;;  %v1007_v11 = vmul.f32 %v1934_v15, %v1689_v56 }
 0x200   : > { %v798_v62 = vpop.f32.mrf.mxu0 }
 0x201   : > { %956 = vmatpush.msrb.mxu0 %v877_v32  ;;  %v801_v63 = vadd.f32 %v798_v62, %v731_v61  ;;  %v919_v62 = vmul.f32 %v1938_v57, %v1689_v56 }
 0x203   : > { %957 = vmatpush.msrb.mxu0 %v876_v59  ;;  %1390 = vst [vmem:[%s1808_s19 + $0x8] sm:$0xff] %v801_v63  ;;  %v1418_v59 = vld [vmem:[%s1521_s11 + $0xa0] sm:$0xff] }
 0x204   : > { %v1945_v6 = vpop.f32.mrf.mxu1 }
 0x205   : > { %958 = vmatpush.msrb.mxu0 %v875_v58  ;;  %v1018_v7 = vmul.f32 %v1945_v6, %v1582_v19  ;;  %v1951_v10 = vpop.f32.mrf.mxu2  ;;  %v1016_v24 = vmul.f32 %v1945_v6, %v1594_v22  ;;  %v1014_v30 = vmul.f32 %v1945_v6, %v1614_v29  ;;  %v1012_v41 = vmul.f32 %v1945_v6, %v1634_v36 }
 0x206   : > { %v930_v16 = vmul.f32 %v1951_v10, %v1582_v19  ;;  %v928_v17 = vmul.f32 %v1951_v10, %v1594_v22  ;;  %v926_v40 = vmul.f32 %v1951_v10, %v1614_v29  ;;  %v924_v48 = vmul.f32 %v1951_v10, %v1634_v36 }
 0x207   : > { %959 = vmatpush.msrb.mxu0 %v874_v2  ;;  %1019 = vmatpush.msra.mxu2 %v1018_v7  ;;  %v1010_v50 = vmul.f32 %v1945_v6, %v1652_v42  ;;  %v922_v54 = vmul.f32 %v1951_v10, %v1652_v42  ;;  %v1008_v55 = vmul.f32 %v1945_v6, %v1676_v51 }
 0x208   : > { %931 = vmatpush.msrb.mxu3 %v930_v16  ;;  %v920_v32 = vmul.f32 %v1951_v10, %v1676_v51  ;;  %v1006_v61 = vmul.f32 %v1945_v6, %v1700_v60  ;;  %v1005_v58 = vmul.f32 %v1934_v15, %v1711_v4  ;;  %v918_v63 = vmul.f32 %v1951_v10, %v1700_v60 }
 0x209   : > { %960 = vmatpush.msrb.mxu0 %v873_v9  ;;  %1020 = vmatpush.msra.mxu2 %v1017_v12  ;;  %v1004_v2 = vmul.f32 %v1945_v6, %v1722_v8  ;;  %v917_v7 = vmul.f32 %v1938_v57, %v1711_v4  ;;  %v832_v9 = vpop.f32.mrf.mxu3  ;;  %v1003_v12 = vmul.f32 %v1934_v15, %v1733_v13  ;;  %v1414_v15 = vld [vmem:[%s1521_s11 + $0x90] sm:$0xff] }
 0x20a   : > { %932 = vmatpush.msrb.mxu3 %v929_v25  ;;  %v916_v16 = vmul.f32 %v1951_v10, %v1722_v8  ;;  %v915_v6 = vmul.f32 %v1938_v57, %v1733_v13  ;;  %v830_v25 = vadd.f32 %v829_v45, %v1678_v52  ;;  %v1415_v57 = vld [vmem:[%s1521_s11 + $0x98] sm:$0xff]  ;;  %v1422_v10 = vld [vmem:[%s1521_s11 + $0xb0] sm:$0xff] }
 0x20b   : > { %961 = vmatpush.msrb.mxu0 %v872_v23  ;;  %1021 = vmatpush.msra.mxu2 %v1016_v24  ;;  %v1419_v23 = vld [vmem:[%s1521_s11 + $0xa8] sm:$0xff]  ;;  %v833_v24 = vadd.f32 %v832_v9, %v1771_v43 }
 0x20c   : > { %933 = vmatpush.msrb.mxu3 %v928_v17 }
 0x20d   : > { %962 = vmatpush.msrb.mxu0 %v871_v27  ;;  %1022 = vmatpush.msra.mxu2 %v1015_v20  ;;  %v1423_v27 = vld [vmem:[%s1521_s11 + $0xb8] sm:$0xff] }
 0x20e   : > { %934 = vmatpush.msrb.mxu3 %v927_v31 }
 0x20f   : > { %963 = vmatpush.msrb.mxu0 %v870_v5  ;;  %1023 = vmatpush.msra.mxu2 %v1014_v30 }
 0x210   : > { %935 = vmatpush.msrb.mxu3 %v926_v40 }
 0x211   : > { %964 = vmatpush.msrb.mxu0 %v869_v34  ;;  %1024 = vmatpush.msra.mxu2 %v1013_v37 }
 0x212   : > { %936 = vmatpush.msrb.mxu3 %v925_v18 }
 0x213   : > { %965 = vmatpush.msrb.mxu0 %v868_v28  ;;  %1025 = vmatpush.msra.mxu2 %v1012_v41 }
 0x214   : > { %937 = vmatpush.msrb.mxu3 %v924_v48 }
 0x215   : > { %966 = vmatpush.msrb.mxu0 %v867_v44  ;;  %1026 = vmatpush.msra.mxu2 %v1011_v47 }
 0x216   : > { %967 = vmatmul.f32.vlgmr.msrb.gmra.mxu0 %v827_v38  ;;  %938 = vmatpush.msrb.mxu3 %v923_v49 }
 0x217   : > { %1144 = vmatpush.msra.mxu0 %v1496_v0  ;;  %1027 = vmatpush.msra.mxu2 %v1010_v50  ;;  %v2058_v50 = vpop.f32.mrf.mxu1 }
 0x218   : > { %939 = vmatpush.msrb.mxu3 %v922_v54 }
 0x219   : > { %1145 = vmatpush.msra.mxu0 %v1501_v1  ;;  %1028 = vmatpush.msra.mxu2 %v1009_v53 }
 0x21a   : > { %940 = vmatpush.msrb.mxu3 %v921_v3 }
 0x21b   : > { %1029 = vmatpush.msra.mxu2 %v1008_v55 }
 0x21c   : > { %941 = vmatpush.msrb.mxu3 %v920_v32 }
 0x21d   : > { %1030 = vmatpush.msra.mxu2 %v1007_v11 }
 0x21e   : > { %1420 = vmatmul.msk.f32.vlgmr.msra.gmra.mxu0 %vm362_vm1, %v1418_v59  ;;  %942 = vmatpush.msrb.mxu3 %v919_v62 }
 0x21f   : > { %1031 = vmatpush.msra.mxu2 %v1006_v61  ;;  %v1067_v59 = vpop.f32.mrf.mxu1 }
 0x220   : > { %943 = vmatpush.msrb.mxu3 %v918_v63  ;;  %v1068_v63 = vadd.f32 %v1067_v59, %v1678_v52 }
 0x221   : > { %1032 = vmatpush.msra.mxu2 %v1005_v58 }
 0x222   : > { %944 = vmatpush.msrb.mxu3 %v917_v7 }
 0x223   : > { %1033 = vmatpush.msra.mxu2 %v1004_v2 }
 0x224   : > { %945 = vmatpush.msrb.mxu3 %v916_v16 }
 0x225   : > { %1034 = vmatpush.msra.mxu2 %v1003_v12 }
 0x226   : > { %1421 = vmatmul.msk.f32.gmra.mxu0 %vm362_vm1, %v1419_v23  ;;  %1035 = vmatmul.f32.vlgmr.msra.gmra.mxu2 %v833_v24 }
 0x227   : > { %946 = vmatpush.msrb.mxu3 %v915_v6 }
 0x228   : > { %947 = vmatmul.f32.vlgmr.msrb.gmra.mxu3 %v830_v25 }
 0x229   : > { %1096 = vmatpush.msra.mxu3 %v1496_v0 }
 0x22b   : > { %1097 = vmatpush.msra.mxu3 %v1501_v1 }
 0x22d   : > { %1232 = vmatpush.msrb.mxu3 %v1496_v0 }
 0x22f   : > { %1233 = vmatpush.msrb.mxu3 %v1501_v1 }
 0x230   : > { %1416 = vmatmul.msk.f32.vlgmr.msra.gmra.mxu3 %vm362_vm1, %v1414_v15 }
 0x238   : > { %1417 = vmatmul.msk.f32.gmra.mxu3 %vm362_vm1, %v1415_v57 }
 0x240   : > { %1424 = vmatmul.msk.f32.vlgmr.msrb.gmra.mxu3 %vm362_vm1, %v1422_v10 }
 0x248   : > { %1425 = vmatmul.msk.f32.gmra.mxu3 %vm362_vm1, %v1423_v27 }
 0x293   : > { %v968_v20 = vpop.f32.mrf.mxu0 }
 0x29b   : > { %v1147_v17 = vpop.f32.mrf.mxu0 }
 0x29c   : > { %v1167_v0 = vmul.f32 %v1147_v17, %v1589_v21  ;;  %v1165_v31 = vmul.f32 %v1147_v17, %v1605_v26  ;;  %v1163_v40 = vmul.f32 %v1147_v17, %v1625_v33  ;;  %v1161_v44 = vmul.f32 %v1147_v17, %v1643_v39 }
 0x29d   : > { %v1159_v38 = vmul.f32 %v1147_v17, %v1663_v46  ;;  %v1157_v53 = vmul.f32 %v1147_v17, %v1689_v56  ;;  %v1155_v3 = vmul.f32 %v1147_v17, %v1711_v4  ;;  %v1153_v62 = vmul.f32 %v1147_v17, %v1733_v13 }
 0x2a3   : > { %v1150_v5 = vpop.f32.mrf.mxu0 }
 0x2a4   : > { %v1168_v30 = vmul.f32 %v1150_v5, %v1582_v19  ;;  %v1166_v1 = vmul.f32 %v1150_v5, %v1594_v22  ;;  %v1164_v34 = vmul.f32 %v1150_v5, %v1614_v29  ;;  %v1162_v18 = vmul.f32 %v1150_v5, %v1634_v36 }
 0x2a5   : > { %v1160_v47 = vmul.f32 %v1150_v5, %v1652_v42  ;;  %v1158_v49 = vmul.f32 %v1150_v5, %v1676_v51  ;;  %v1156_v54 = vmul.f32 %v1150_v5, %v1700_v60  ;;  %v1154_v32 = vmul.f32 %v1150_v5, %v1722_v8 }
 0x2a6   : > { %1169 = vmatpush.msrb.mxu1 %v1168_v30  ;;  %v1065_v30 = vadd.f32 %v2058_v50, %v1735_v14 }
 0x2a8   : > { %1170 = vmatpush.msrb.mxu1 %v1167_v0 }
 0x2a9   : > { %v1036_v28 = vpop.f32.mrf.mxu2 }
 0x2aa   : > { %1171 = vmatpush.msrb.mxu1 %v1166_v1 }
 0x2ab   : > { %v948_v35 = vpop.f32.mrf.mxu3 }
 0x2ac   : > { %v969_v37 = vadd.f32 %v968_v20, %v948_v35  ;;  %1172 = vmatpush.msrb.mxu1 %v1165_v31  ;;  %v1070_v31 = vpop.f32.mrf.mxu1 }
 0x2ae   : > { %v1039_v41 = vadd.f32 %v1036_v28, %v969_v37  ;;  %1173 = vmatpush.msrb.mxu1 %v1164_v34  ;;  %v1071_v34 = vadd.f32 %v1070_v31, %v1771_v43 }
 0x2b0   : > { %1408 = vst [vmem:[%s1808_s19 + $0x10] sm:$0xff] %v1039_v41  ;;  %1174 = vmatpush.msrb.mxu1 %v1163_v40 }
 0x2b2   : > { %1175 = vmatpush.msrb.mxu1 %v1162_v18 }
 0x2b3   : > { %v2055_v48 = vpop.f32.mrf.mxu3 }
 0x2b4   : > { %1176 = vmatpush.msrb.mxu1 %v1161_v44  ;;  %v1119_v11 = vmul.f32 %v2055_v48, %v1589_v21  ;;  %v1117_v58 = vmul.f32 %v2055_v48, %v1605_v26  ;;  %v1115_v9 = vmul.f32 %v2055_v48, %v1625_v33  ;;  %v1113_v16 = vmul.f32 %v2055_v48, %v1643_v39 }
 0x2b5   : > { %v1111_v6 = vmul.f32 %v2055_v48, %v1663_v46  ;;  %v1109_v10 = vmul.f32 %v2055_v48, %v1689_v56 }
 0x2b6   : > { %1177 = vmatpush.msrb.mxu1 %v1160_v47 }
 0x2b8   : > { %1178 = vmatpush.msrb.mxu1 %v1159_v38 }
 0x2ba   : > { %1179 = vmatpush.msrb.mxu1 %v1158_v49 }
 0x2bb   : > { %v1102_v45 = vpop.f32.mrf.mxu3 }
 0x2bc   : > { %1180 = vmatpush.msrb.mxu1 %v1157_v53  ;;  %v1120_v55 = vmul.f32 %v1102_v45, %v1582_v19  ;;  %v1118_v61 = vmul.f32 %v1102_v45, %v1594_v22  ;;  %v1116_v7 = vmul.f32 %v1102_v45, %v1614_v29  ;;  %v1114_v12 = vmul.f32 %v1102_v45, %v1634_v36 }
 0x2bd   : > { %v1112_v52 = vmul.f32 %v1102_v45, %v1652_v42  ;;  %v1110_v15 = vmul.f32 %v1102_v45, %v1676_v51  ;;  %v1108_v27 = vmul.f32 %v1102_v45, %v1700_v60  ;;  %v1106_v17 = vmul.f32 %v1102_v45, %v1722_v8 }
 0x2be   : > { %1181 = vmatpush.msrb.mxu1 %v1156_v54  ;;  %1189 = vmatpush.msrb.mxu2 %v1120_v55 }
 0x2c0   : > { %1182 = vmatpush.msrb.mxu1 %v1155_v3  ;;  %1190 = vmatpush.msrb.mxu2 %v1119_v11 }
 0x2c2   : > { %1183 = vmatpush.msrb.mxu1 %v1154_v32  ;;  %1191 = vmatpush.msrb.mxu2 %v1118_v61 }
 0x2c3   : > { %v1235_v2 = vpop.f32.mrf.mxu3 }
 0x2c4   : > { %1184 = vmatpush.msrb.mxu1 %v1153_v62  ;;  %1192 = vmatpush.msrb.mxu2 %v1117_v58  ;;  %v1255_v25 = vmul.f32 %v1235_v2, %v1589_v21  ;;  %v1107_v21 = vmul.f32 %v2055_v48, %v1711_v4  ;;  %v1247_v0 = vmul.f32 %v1235_v2, %v1663_v46 }
 0x2c5   : > { %1185 = vmatmul.f32.vlgmr.msrb.gmra.mxu1 %v1068_v63  ;;  %v1245_v1 = vmul.f32 %v1235_v2, %v1689_v56  ;;  %v1243_v14 = vmul.f32 %v1235_v2, %v1711_v4  ;;  %v1241_v46 = vmul.f32 %v1235_v2, %v1733_v13 }
 0x2c6   : > { %1193 = vmatpush.msrb.mxu2 %v1116_v7 }
 0x2c8   : > { %1194 = vmatpush.msrb.mxu2 %v1115_v9 }
 0x2ca   : > { %1195 = vmatpush.msrb.mxu2 %v1114_v12 }
 0x2cb   : > { %v1238_v23 = vpop.f32.mrf.mxu3 }
 0x2cc   : > { %1196 = vmatpush.msrb.mxu2 %v1113_v16  ;;  %v1256_v24 = vmul.f32 %v1238_v23, %v1582_v19  ;;  %v1254_v57 = vmul.f32 %v1238_v23, %v1594_v22  ;;  %v1253_v19 = vmul.f32 %v1235_v2, %v1605_v26  ;;  %v1252_v20 = vmul.f32 %v1238_v23, %v1614_v29 }
 0x2cd   : > { %v1251_v22 = vmul.f32 %v1235_v2, %v1625_v33  ;;  %v1250_v5 = vmul.f32 %v1238_v23, %v1634_v36  ;;  %v1105_v26 = vmul.f32 %v2055_v48, %v1733_v13  ;;  %v1249_v29 = vmul.f32 %v1235_v2, %v1643_v39 }
 0x2ce   : > { %1197 = vmatpush.msrb.mxu2 %v1112_v52  ;;  %1257 = vmatpush.msrb.mxu0 %v1256_v24  ;;  %v1248_v33 = vmul.f32 %v1238_v23, %v1652_v42  ;;  %v1246_v36 = vmul.f32 %v1238_v23, %v1676_v51  ;;  %v1244_v39 = vmul.f32 %v1238_v23, %v1700_v60 }
 0x2cf   : > { %v1242_v42 = vmul.f32 %v1238_v23, %v1722_v8 }
 0x2d0   : > { %1198 = vmatpush.msrb.mxu2 %v1111_v6  ;;  %1258 = vmatpush.msrb.mxu0 %v1255_v25 }
 0x2d2   : > { %1199 = vmatpush.msrb.mxu2 %v1110_v15  ;;  %1259 = vmatpush.msrb.mxu0 %v1254_v57 }
 0x2d4   : > { %1200 = vmatpush.msrb.mxu2 %v1109_v10  ;;  %1260 = vmatpush.msrb.mxu0 %v1253_v19 }
 0x2d6   : > { %1201 = vmatpush.msrb.mxu2 %v1108_v27  ;;  %1261 = vmatpush.msrb.mxu0 %v1252_v20 }
 0x2d8   : > { %1202 = vmatpush.msrb.mxu2 %v1107_v21  ;;  %1262 = vmatpush.msrb.mxu0 %v1251_v22 }
 0x2da   : > { %1203 = vmatpush.msrb.mxu2 %v1106_v17  ;;  %1263 = vmatpush.msrb.mxu0 %v1250_v5 }
 0x2dc   : > { %1204 = vmatpush.msrb.mxu2 %v1105_v26  ;;  %1264 = vmatpush.msrb.mxu0 %v1249_v29 }
 0x2dd   : > { %1205 = vmatmul.f32.vlgmr.msrb.gmra.mxu2 %v1065_v30 }
 0x2de   : > { %1265 = vmatpush.msrb.mxu0 %v1248_v33 }
 0x2e0   : > { %1266 = vmatpush.msrb.mxu0 %v1247_v0 }
 0x2e2   : > { %1267 = vmatpush.msrb.mxu0 %v1246_v36 }
 0x2e4   : > { %1268 = vmatpush.msrb.mxu0 %v1245_v1 }
 0x2e6   : > { %1269 = vmatpush.msrb.mxu0 %v1244_v39 }
 0x2e8   : > { %1270 = vmatpush.msrb.mxu0 %v1243_v14 }
 0x2ea   : > { %1271 = vmatpush.msrb.mxu0 %v1242_v42 }
 0x2ec   : > { %1272 = vmatpush.msrb.mxu0 %v1241_v46 }
 0x2ed   : > { %1273 = vmatmul.f32.vlgmr.msrb.gmra.mxu0 %v1071_v34 }
 0x342   : > { %v1186_v56 = vpop.f32.mrf.mxu1 }
 0x360   : > { %v1206_v51 = vpop.f32.mrf.mxu2 }
 0x361   : > { %v1207_v35 = vadd.f32 %v1206_v51, %v1186_v56 }
 0x36a   : > { %v1274_v37 = vpop.f32.mrf.mxu0 }
 0x36b   : > { %v1277_v60 = vadd.f32 %v1274_v37, %v1207_v35 }
 0x36d   : > { %1426 = vst [vmem:[%s1808_s19 + $0x18] sm:$0xff] %v1277_v60 }
 0x36e PF: > { %s16_s21 = sadd.s32 1, %s1447_s21  }
 0x36f   : > { %p13_p4 = scmp.ge.s32.totalorder %s16_s21, 4  }
 0x371   :  { %15 = sbr.rel (!%p13_p4) target bundleno = 1 (0x1), region = 94 }

</bundles_post_ra>
